<compile_context>
chip_gen: v7x
topology: tpu7x:2x2x1
jax: 0.10.0
libtpu: 0.0.40
codegen_flags: <defaults>
</compile_context>

<pallas_src>
import math

import jax
import jax.numpy as jnp
from jax import lax
from jax.experimental import pallas as pl
from jax.experimental.pallas import tpu as pltpu

PAD = 0  # nn.Embedding(padding_idx=PAD) only affects gradients / init; _reset_parameters
         # overwrites the whole table, so the forward pass needs no special PAD handling.


def _round_up(x, m):
    return (x + m - 1) // m * m


# --------------------------------------------------------------------------- kernel 1
def _lstm_kernel(x_in_ref, wih_ref, whh_ref, bsum_ref, h0_ref, c0_ref,
                 out_ref, x_ref, gpre_ref):
    """Multi-layer LSTM over the full (time-major) sequence.

    x_in_ref : (T*B_pad, H)  bf16 VMEM  embedded tokens (gathered in the wrapper)
    wih_ref  : (L, H, 4H)    bf16 VMEM  input-to-hidden weights (pre-transposed)
    whh_ref  : (L, H, 4H)    bf16 VMEM  hidden-to-hidden weights (pre-transposed)
    bsum_ref : (L, 1, 4H)    f32  VMEM  b_ih + b_hh (pre-summed in the wrapper)
    h0_ref   : (L, B_pad, H) f32  VMEM
    c0_ref   : (L, B_pad, H) f32  VMEM
    out_ref  : (T*B_pad, H)  bf16 VMEM  rnn_out (time-major); last layer writes it directly
    x_ref    : (T*B_pad, H)  bf16 VMEM scratch  intermediate layers' output sequence
    gpre_ref : (T*B_pad, 4H) bf16 VMEM scratch  hoisted X @ W_ih + b for the whole sequence
    """
    R, H = x_in_ref.shape
    L, B_pad, _ = h0_ref.shape
    T = R // B_pad

    # TODO(synk): inter-layer dropout (training-mode nn.LSTM only) is not applied (eval semantics).
    for l in range(L):
        src = x_in_ref if l == 0 else x_ref          # layer input sequence
        dst = out_ref if l == L - 1 else x_ref       # layer output sequence

        # Hoisted input-to-hidden projection: one large MXU matmul per layer, bias folded once.
        gpre_ref[...] = (
            jnp.dot(src[...], wih_ref[l], preferred_element_type=jnp.float32)
            + bsum_ref[l]).astype(gpre_ref.dtype)

        whh_l = whh_ref[l]  # (H, 4H) bf16, loaded once per layer

        def step(t, carry):
            h, c = carry                                        # h: bf16, c: f32
            off = pl.multiple_of(t * B_pad, B_pad)
            g = (gpre_ref[pl.ds(off, B_pad), :]
                 + jnp.dot(h, whh_l, preferred_element_type=jnp.float32))
            # PyTorch gate order: i, f, g, o.  (At production H (multiple of 128) these
            # slices are free vreg views; at the toy H=32 they are sub-vreg lane slices.)
            i_g = jax.nn.sigmoid(g[:, 0:H])
            f_g = jax.nn.sigmoid(g[:, H:2 * H])
            g_g = jnp.tanh(g[:, 2 * H:3 * H])
            o_g = jax.nn.sigmoid(g[:, 3 * H:4 * H])
            c = f_g * c + i_g * g_g
            h = (o_g * jnp.tanh(c)).astype(jnp.bfloat16)
            dst[pl.ds(off, B_pad), :] = h                       # full (16, H) bf16 tile store
            return (h, c)

        lax.fori_loop(0, T, step,
                      (h0_ref[l].astype(jnp.bfloat16), c0_ref[l]),
                      unroll=min(T, 8))


# --------------------------------------------------------------------------- kernel 2
def _proj_kernel(x_ref, w_ref, b_ref, logp_ref, words_ref, m_ref, l_ref):
    """Single-pass output projection + log_softmax + argmax.

    Grid = (row_tiles, V_tiles).  The (TR, V_pad) logp block is resident across the V sweep:
    raw logits are written into it tile-by-tile while online-softmax (max, sum-exp)
    statistics accumulate; at the last V tile the slab is normalized in place and the
    first-index argmax (torch.max tie-breaking) is written.
    """
    j = pl.program_id(1)
    nv = pl.num_programs(1)
    tv = w_ref.shape[1]

    # bf16 x bf16 -> f32 MXU matmul; bias (padded V columns carry -1e30) added in f32.
    s = jnp.dot(x_ref[...], w_ref[...], preferred_element_type=jnp.float32) + b_ref[...]

    @pl.when(j == 0)
    def _():
        m_ref[...] = jnp.full(m_ref.shape, -jnp.inf, jnp.float32)
        l_ref[...] = jnp.zeros(l_ref.shape, jnp.float32)

    m_prev = m_ref[...]
    m_new = jnp.maximum(m_prev, jnp.max(s, axis=-1, keepdims=True))
    l_ref[...] = (l_ref[...] * jnp.exp(m_prev - m_new)
                  + jnp.sum(jnp.exp(s - m_new), axis=-1, keepdims=True))
    m_ref[...] = m_new

    # Stash the raw logits for this V tile into the resident output slab (lane-aligned).
    off = pl.multiple_of(j * tv, tv)
    logp_ref[:, pl.ds(off, tv)] = s

    @pl.when(j == nv - 1)
    def _():
        m = m_ref[...]
        lse = m + jnp.log(l_ref[...])
        slab = logp_ref[...]                      # raw logits, whole row, f32 (exact)
        logp_ref[...] = slab - lse                # normalize in place
        col = lax.broadcasted_iota(jnp.int32, slab.shape, 1)
        words_ref[...] = jnp.min(jnp.where(slab >= m, col, jnp.int32(2 ** 30)),
                                 axis=-1, keepdims=True)


# --------------------------------------------------------------------------- wrapper
def critic_forward(inputs, hidden, params):
    """Equivalent of Critic.forward(inputs, hidden) -> (log_softmax(props), argmax words)."""
    h0, c0 = hidden                                   # (L, B, H) each
    tokens = inputs[:, :-1].astype(jnp.int32)         # (B, T)
    B, T = tokens.shape
    V, H = params["emb"].shape
    L = params["w_ih"].shape[0]

    # ---- padding / time-major layout (row r = t * B_pad + b) ----
    B_pad = _round_up(max(B, 16), 16)                 # bf16 sublane tile
    R = T * B_pad

    tok_tb = jnp.zeros((T, B_pad), jnp.int32).at[:, :B].set(tokens.T)
    # Embedding gather in the wrapper (XLA); keeps the V x H table out of kernel VMEM.
    x_emb = jnp.take(params["emb"], tok_tb.reshape(R), axis=0).astype(jnp.bfloat16)

    w_ih_t = jnp.transpose(params["w_ih"], (0, 2, 1)).astype(jnp.bfloat16)  # (L, H, 4H)
    w_hh_t = jnp.transpose(params["w_hh"], (0, 2, 1)).astype(jnp.bfloat16)  # (L, H, 4H)
    b_sum = (params["b_ih"] + params["b_hh"]).reshape(L, 1, 4 * H).astype(jnp.float32)

    h0p = jnp.zeros((L, B_pad, H), jnp.float32).at[:, :B, :].set(h0.astype(jnp.float32))
    c0p = jnp.zeros((L, B_pad, H), jnp.float32).at[:, :B, :].set(c0.astype(jnp.float32))

    # ---- kernel 1: LSTM recurrence (single core, fully VMEM-resident) ----
    # TODO(synk): at very long T / large H the (R, 4H) gpre slab should be re-budgeted or
    # streamed per time chunk; fine at these shapes.
    rnn_out = pl.pallas_call(
        _lstm_kernel,
        out_shape=jax.ShapeDtypeStruct((R, H), jnp.bfloat16),
        in_specs=[pl.BlockSpec(memory_space=pltpu.MemorySpace.VMEM),   # embedded tokens
                  pl.BlockSpec(memory_space=pltpu.MemorySpace.VMEM),   # w_ih (bf16)
                  pl.BlockSpec(memory_space=pltpu.MemorySpace.VMEM),   # w_hh (bf16)
                  pl.BlockSpec(memory_space=pltpu.MemorySpace.VMEM),   # b_ih + b_hh
                  pl.BlockSpec(memory_space=pltpu.MemorySpace.VMEM),   # h0
                  pl.BlockSpec(memory_space=pltpu.MemorySpace.VMEM)],  # c0
        out_specs=pl.BlockSpec(memory_space=pltpu.MemorySpace.VMEM),
        scratch_shapes=[pltpu.VMEM((R, H), jnp.bfloat16),
                        pltpu.VMEM((R, 4 * H), jnp.bfloat16)],
        compiler_params=pltpu.CompilerParams(vmem_limit_bytes=64 * 1024 * 1024),
    )(x_emb, w_ih_t, w_hh_t, b_sum, h0p, c0p)

    # ---- kernel 2: single-pass gridded projection + log_softmax + argmax ----
    TV = min(1024, _round_up(V, 128))                 # lane-dense V tiles
    V_pad = _round_up(V, TV)
    NV = V_pad // TV
    # Row tiles: keep TR <= 128 (bounds the resident (TR, V_pad) f32 slab on v7x's 64 MiB
    # VMEM) and aim for >= 2 row tiles so the "parallel" axis actually uses both v7x TCs.
    if R >= 256:
        TR = 128
    else:
        TR = min(_round_up(max(R // 2, 16), 16), 128)
    RP = _round_up(R, TR)
    NR = RP // TR

    x = rnn_out if RP == R else jnp.zeros((RP, H), jnp.bfloat16).at[:R].set(rnn_out)
    w_out_p = jnp.zeros((H, V_pad), jnp.bfloat16).at[:, :V].set(
        params["w_out"].T.astype(jnp.bfloat16))
    b_out_p = jnp.full((1, V_pad), -1e30, jnp.float32).at[:, :V].set(
        params["b_out"].astype(jnp.float32)[None, :])

    cost = pl.CostEstimate(
        flops=2 * RP * H * V_pad,                     # logits matmul, single pass
        transcendentals=RP * V_pad + RP,              # exp + log
        bytes_accessed=RP * H * 2 + NR * H * V_pad * 2 + RP * V_pad * 4 + RP * 4)

    # TODO(synk): on v5e a deeper weight-stream buffer (pipeline_mode=pl.Buffered(3) on the
    # W_out spec) can further hide the HBM DMA; omitted here to keep one config per chip.
    logp_pad, words_pad = pl.pallas_call(
        _proj_kernel,
        out_shape=(jax.ShapeDtypeStruct((RP, V_pad), jnp.float32),
                   jax.ShapeDtypeStruct((RP, 1), jnp.int32)),
        grid=(NR, NV),
        in_specs=[pl.BlockSpec((TR, H), lambda i, j: (i, 0)),
                  pl.BlockSpec((H, TV), lambda i, j: (0, j)),
                  pl.BlockSpec((1, TV), lambda i, j: (0, j))],
        out_specs=(pl.BlockSpec((TR, V_pad), lambda i, j: (i, 0)),   # resident across j
                   pl.BlockSpec((TR, 1), lambda i, j: (i, 0))),
        scratch_shapes=[pltpu.VMEM((TR, 1), jnp.float32),   # running max
                        pltpu.VMEM((TR, 1), jnp.float32)],  # running sum-exp
        compiler_params=pltpu.CompilerParams(
            dimension_semantics=("parallel", "arbitrary"),
            vmem_limit_bytes=64 * 1024 * 1024),
        cost_estimate=cost,
    )(x, w_out_p, b_out_p)

    # ---- un-pad and return batch-major (B, T, ...) like the PyTorch module ----
    logp = logp_pad[:R, :V].reshape(T, B_pad, V)[:, :B, :].transpose(1, 0, 2)
    words = words_pad[:R, 0].reshape(T, B_pad)[:, :B].T
    return logp, words


def feed_enc(enc, rnn_layers):
    """Equivalent of Critic.feed_enc: h = enc broadcast over layers, c = zeros."""
    B, H = enc.shape
    h = jnp.broadcast_to(enc[None, :, :], (rnn_layers, B, H)).astype(jnp.float32)
    c = jnp.zeros((rnn_layers, B, H), jnp.float32)
    return h, c


def init_params(key, vocab_size, dec_hsz, rnn_layers):
    ks = jax.random.split(key, 8)
    stdv_v = 1.0 / math.sqrt(vocab_size)   # _reset_parameters
    stdv_h = 1.0 / math.sqrt(dec_hsz)      # default LSTM / Linear-bias init
    H = dec_hsz
    return {
        "emb": jax.random.uniform(ks[0], (vocab_size, H), jnp.float32, -stdv_v, stdv_v),
        "w_ih": jax.random.uniform(ks[1], (rnn_layers, 4 * H, H), jnp.float32, -stdv_h, stdv_h),
        "w_hh": jax.random.uniform(ks[2], (rnn_layers, 4 * H, H), jnp.float32, -stdv_h, stdv_h),
        "b_ih": jax.random.uniform(ks[3], (rnn_layers, 4 * H), jnp.float32, -stdv_h, stdv_h),
        "b_hh": jax.random.uniform(ks[4], (rnn_layers, 4 * H), jnp.float32, -stdv_h, stdv_h),
        "w_out": jax.random.uniform(ks[5], (vocab_size, H), jnp.float32, -stdv_v, stdv_v),
        "b_out": jax.random.uniform(ks[6], (vocab_size,), jnp.float32, -stdv_h, stdv_h),
    }


def _reference_forward(inputs, hidden, params):
    """Pure-JAX f32 reference mirroring Critic.forward (for a loose correctness check)."""
    h0, c0 = hidden
    tokens = inputs[:, :-1]
    _, T = tokens.shape
    _, H = params["emb"].shape
    L = params["w_ih"].shape[0]
    x = params["emb"][tokens]                          # (B, T, H)
    h = [h0[l] for l in range(L)]
    c = [c0[l] for l in range(L)]
    outs = []
    for t in range(T):
        inp = x[:, t, :]
        for l in range(L):
            g = (inp @ params["w_ih"][l].T + h[l] @ params["w_hh"][l].T
                 + params["b_ih"][l] + params["b_hh"][l])
            i_g = jax.nn.sigmoid(g[:, :H])
            f_g = jax.nn.sigmoid(g[:, H:2 * H])
            g_g = jnp.tanh(g[:, 2 * H:3 * H])
            o_g = jax.nn.sigmoid(g[:, 3 * H:])
            c[l] = f_g * c[l] + i_g * g_g
            h[l] = o_g * jnp.tanh(c[l])
            inp = h[l]
        outs.append(inp)
    rnn = jnp.stack(outs, axis=1)
    props = rnn @ params["w_out"].T + params["b_out"]
    return jax.nn.log_softmax(props, axis=-1), jnp.argmax(props, axis=-1)


if __name__ == "__main__":
    vocab_size, dec_hsz, rnn_layers = 50, 32, 2
    bsz, max_len = 2, 8

    key = jax.random.PRNGKey(0)
    k_par, k_inp, k_enc = jax.random.split(key, 3)

    params = init_params(k_par, vocab_size, dec_hsz, rnn_layers)
    inputs = jax.random.randint(k_inp, (bsz, max_len), 0, vocab_size, dtype=jnp.int32)
    enc = jax.random.normal(k_enc, (bsz, dec_hsz), jnp.float32)

    hidden = feed_enc(enc, rnn_layers)
    log_probs, words = critic_forward(inputs, hidden, params)
    jax.block_until_ready((log_probs, words))

    assert log_probs.shape == (bsz, max_len - 1, vocab_size)
    assert words.shape == (bsz, max_len - 1)

    # sanity: rows of exp(logp) sum to 1, and the bf16 kernel tracks the f32 reference loosely
    row_sums = jnp.sum(jnp.exp(log_probs), axis=-1)
    assert float(jnp.max(jnp.abs(row_sums - 1.0))) < 1e-3
    ref_logp, _ = _reference_forward(inputs, hidden, params)
    assert float(jnp.max(jnp.abs(log_probs - ref_logp))) < 0.1

    print("KERNEL_OK")
</pallas_src>

<mosaic_0001>
module attributes {stable_mosaic.version = 11 : i64} {
  func.func @_lstm_kernel(%arg0: memref<112x32xbf16, #tpu.memory_space<vmem>>, %arg1: memref<2x32x128xbf16, #tpu.memory_space<vmem>>, %arg2: memref<2x32x128xbf16, #tpu.memory_space<vmem>>, %arg3: memref<2x1x128xf32, #tpu.memory_space<vmem>>, %arg4: memref<2x16x32xf32, #tpu.memory_space<vmem>>, %arg5: memref<2x16x32xf32, #tpu.memory_space<vmem>>, %arg6: memref<112x32xbf16, #tpu.memory_space<vmem>>, %arg7: memref<112x32xbf16, #tpu.memory_space<vmem>>, %arg8: memref<112x128xbf16, #tpu.memory_space<vmem>>) attributes {dimension_semantics = [], scalar_prefetch = 0 : i64, scratch_operands = 2 : i64, tpu.core_type = #tpu.core_type<tc>} {
    %c0 = arith.constant 0 : index
    %c0_0 = arith.constant 0 : index
    %0 = vector.load %arg0[%c0, %c0_0] : memref<112x32xbf16, #tpu.memory_space<vmem>>, vector<112x32xbf16>
    %c0_1 = arith.constant 0 : index
    %c0_2 = arith.constant 0 : index
    %c0_3 = arith.constant 0 : index
    %1 = vector.load %arg1[%c0_1, %c0_2, %c0_3] : memref<2x32x128xbf16, #tpu.memory_space<vmem>>, vector<1x32x128xbf16>
    %2 = vector.shape_cast %1 : vector<1x32x128xbf16> to vector<32x128xbf16>
    %cst = arith.constant dense<0.000000e+00> : vector<112x128xf32>
    %3 = tpu.matmul %0, %2, %cst {dimension_numbers = #tpu.dot_dimension_numbers<[1], [0], [0], [1], [0, 0, 1, 1], [], []>} : vector<112x32xbf16>, vector<32x128xbf16>, vector<112x128xf32> -> vector<112x128xf32>
    %c0_4 = arith.constant 0 : index
    %c0_5 = arith.constant 0 : index
    %c0_6 = arith.constant 0 : index
    %4 = vector.load %arg3[%c0_4, %c0_5, %c0_6] : memref<2x1x128xf32, #tpu.memory_space<vmem>>, vector<1x1x128xf32>
    %5 = vector.shape_cast %4 : vector<1x1x128xf32> to vector<1x128xf32>
    %6 = vector.broadcast %5 : vector<1x128xf32> to vector<112x128xf32>
    %7 = arith.addf %3, %6 : vector<112x128xf32>
    %8 = arith.truncf %7 : vector<112x128xf32> to vector<112x128xbf16>
    %c0_7 = arith.constant 0 : index
    %c0_8 = arith.constant 0 : index
    %9 = vector.load %arg8[%c0_7, %c0_8] : memref<112x128xbf16, #tpu.memory_space<vmem>>, vector<112x128xbf16>
    tpu.vector_store %arg8[%c0_7, %c0_8], %8 {strides = array<i32>} : memref<112x128xbf16, #tpu.memory_space<vmem>>, vector<112x128xbf16>,
    %c0_9 = arith.constant 0 : index
    %c0_10 = arith.constant 0 : index
    %c0_11 = arith.constant 0 : index
    %10 = vector.load %arg2[%c0_9, %c0_10, %c0_11] : memref<2x32x128xbf16, #tpu.memory_space<vmem>>, vector<1x32x128xbf16>
    %11 = vector.shape_cast %10 : vector<1x32x128xbf16> to vector<32x128xbf16>
    %c0_12 = arith.constant 0 : index
    %c0_13 = arith.constant 0 : index
    %c0_14 = arith.constant 0 : index
    %12 = vector.load %arg4[%c0_12, %c0_13, %c0_14] : memref<2x16x32xf32, #tpu.memory_space<vmem>>, vector<1x16x32xf32>
    %13 = vector.shape_cast %12 : vector<1x16x32xf32> to vector<16x32xf32>
    %14 = arith.truncf %13 : vector<16x32xf32> to vector<16x32xbf16>
    %c0_15 = arith.constant 0 : index
    %c0_16 = arith.constant 0 : index
    %c0_17 = arith.constant 0 : index
    %15 = vector.load %arg5[%c0_15, %c0_16, %c0_17] : memref<2x16x32xf32, #tpu.memory_space<vmem>>, vector<1x16x32xf32>
    %16 = vector.shape_cast %15 : vector<1x16x32xf32> to vector<16x32xf32>
    %c0_i32 = arith.constant 0 : i32
    %c16_i32 = arith.constant 16 : i32
    %17 = arith.muli %c0_i32, %c16_i32 : i32
    %18 = tpu.assume_multiple %17, 16 : i32
    %19 = arith.index_cast %18 : i32 to index
    %c0_18 = arith.constant 0 : index
    %20 = vector.load %arg8[%19, %c0_18] : memref<112x128xbf16, #tpu.memory_space<vmem>>, vector<16x128xbf16>
    %cst_19 = arith.constant dense<0.000000e+00> : vector<16x128xf32>
    %21 = tpu.matmul %14, %11, %cst_19 {dimension_numbers = #tpu.dot_dimension_numbers<[1], [0], [0], [1], [0, 0, 1, 1], [], []>} : vector<16x32xbf16>, vector<32x128xbf16>, vector<16x128xf32> -> vector<16x128xf32>
    %22 = arith.extf %20 : vector<16x128xbf16> to vector<16x128xf32>
    %23 = arith.addf %22, %21 : vector<16x128xf32>
    %24 = vector.extract_strided_slice %23 {offsets = [0, 0], sizes = [16, 32], strides = [1, 1]} : vector<16x128xf32> to vector<16x32xf32>
    %25 = arith.negf %24 : vector<16x32xf32>
    %26 = math.exp %25 : vector<16x32xf32>
    %cst_20 = arith.constant 1.000000e+00 : f32
    %27 = vector.broadcast %cst_20 : f32 to vector<16x32xf32>
    %28 = arith.addf %27, %26 : vector<16x32xf32>
    %29 = arith.divf %27, %28 : vector<16x32xf32>
    %30 = vector.extract_strided_slice %23 {offsets = [0, 32], sizes = [16, 32], strides = [1, 1]} : vector<16x128xf32> to vector<16x32xf32>
    %31 = arith.negf %30 : vector<16x32xf32>
    %32 = math.exp %31 : vector<16x32xf32>
    %cst_21 = arith.constant 1.000000e+00 : f32
    %33 = vector.broadcast %cst_21 : f32 to vector<16x32xf32>
    %34 = arith.addf %33, %32 : vector<16x32xf32>
    %35 = arith.divf %33, %34 : vector<16x32xf32>
    %36 = vector.extract_strided_slice %23 {offsets = [0, 64], sizes = [16, 32], strides = [1, 1]} : vector<16x128xf32> to vector<16x32xf32>
    %37 = math.tanh %36 : vector<16x32xf32>
    %38 = vector.extract_strided_slice %23 {offsets = [0, 96], sizes = [16, 32], strides = [1, 1]} : vector<16x128xf32> to vector<16x32xf32>
    %39 = arith.negf %38 : vector<16x32xf32>
    %40 = math.exp %39 : vector<16x32xf32>
    %cst_22 = arith.constant 1.000000e+00 : f32
    %41 = vector.broadcast %cst_22 : f32 to vector<16x32xf32>
    %42 = arith.addf %41, %40 : vector<16x32xf32>
    %43 = arith.divf %41, %42 : vector<16x32xf32>
    %44 = arith.mulf %35, %16 : vector<16x32xf32>
    %45 = arith.mulf %29, %37 : vector<16x32xf32>
    %46 = arith.addf %44, %45 : vector<16x32xf32>
    %47 = math.tanh %46 : vector<16x32xf32>
    %48 = arith.mulf %43, %47 : vector<16x32xf32>
    %49 = arith.truncf %48 : vector<16x32xf32> to vector<16x32xbf16>
    %50 = arith.index_cast %18 : i32 to index
    %c0_23 = arith.constant 0 : index
    %51 = vector.load %arg7[%50, %c0_23] : memref<112x32xbf16, #tpu.memory_space<vmem>>, vector<16x32xbf16>
    tpu.vector_store %arg7[%50, %c0_23], %49 {strides = array<i32>} : memref<112x32xbf16, #tpu.memory_space<vmem>>, vector<16x32xbf16>,
    %c1_i32 = arith.constant 1 : i32
    %c16_i32_24 = arith.constant 16 : i32
    %52 = arith.muli %c1_i32, %c16_i32_24 : i32
    %53 = tpu.assume_multiple %52, 16 : i32
    %54 = arith.index_cast %53 : i32 to index
    %c0_25 = arith.constant 0 : index
    %55 = vector.load %arg8[%54, %c0_25] : memref<112x128xbf16, #tpu.memory_space<vmem>>, vector<16x128xbf16>
    %cst_26 = arith.constant dense<0.000000e+00> : vector<16x128xf32>
    %56 = tpu.matmul %49, %11, %cst_26 {dimension_numbers = #tpu.dot_dimension_numbers<[1], [0], [0], [1], [0, 0, 1, 1], [], []>} : vector<16x32xbf16>, vector<32x128xbf16>, vector<16x128xf32> -> vector<16x128xf32>
    %57 = arith.extf %55 : vector<16x128xbf16> to vector<16x128xf32>
    %58 = arith.addf %57, %56 : vector<16x128xf32>
    %59 = vector.extract_strided_slice %58 {offsets = [0, 0], sizes = [16, 32], strides = [1, 1]} : vector<16x128xf32> to vector<16x32xf32>
    %60 = arith.negf %59 : vector<16x32xf32>
    %61 = math.exp %60 : vector<16x32xf32>
    %cst_27 = arith.constant 1.000000e+00 : f32
    %62 = vector.broadcast %cst_27 : f32 to vector<16x32xf32>
    %63 = arith.addf %62, %61 : vector<16x32xf32>
    %64 = arith.divf %62, %63 : vector<16x32xf32>
    %65 = vector.extract_strided_slice %58 {offsets = [0, 32], sizes = [16, 32], strides = [1, 1]} : vector<16x128xf32> to vector<16x32xf32>
    %66 = arith.negf %65 : vector<16x32xf32>
    %67 = math.exp %66 : vector<16x32xf32>
    %cst_28 = arith.constant 1.000000e+00 : f32
    %68 = vector.broadcast %cst_28 : f32 to vector<16x32xf32>
    %69 = arith.addf %68, %67 : vector<16x32xf32>
    %70 = arith.divf %68, %69 : vector<16x32xf32>
    %71 = vector.extract_strided_slice %58 {offsets = [0, 64], sizes = [16, 32], strides = [1, 1]} : vector<16x128xf32> to vector<16x32xf32>
    %72 = math.tanh %71 : vector<16x32xf32>
    %73 = vector.extract_strided_slice %58 {offsets = [0, 96], sizes = [16, 32], strides = [1, 1]} : vector<16x128xf32> to vector<16x32xf32>
    %74 = arith.negf %73 : vector<16x32xf32>
    %75 = math.exp %74 : vector<16x32xf32>
    %cst_29 = arith.constant 1.000000e+00 : f32
    %76 = vector.broadcast %cst_29 : f32 to vector<16x32xf32>
    %77 = arith.addf %76, %75 : vector<16x32xf32>
    %78 = arith.divf %76, %77 : vector<16x32xf32>
    %79 = arith.mulf %70, %46 : vector<16x32xf32>
    %80 = arith.mulf %64, %72 : vector<16x32xf32>
    %81 = arith.addf %79, %80 : vector<16x32xf32>
    %82 = math.tanh %81 : vector<16x32xf32>
    %83 = arith.mulf %78, %82 : vector<16x32xf32>
    %84 = arith.truncf %83 : vector<16x32xf32> to vector<16x32xbf16>
    %85 = arith.index_cast %53 : i32 to index
    %c0_30 = arith.constant 0 : index
    %86 = vector.load %arg7[%85, %c0_30] : memref<112x32xbf16, #tpu.memory_space<vmem>>, vector<16x32xbf16>
    tpu.vector_store %arg7[%85, %c0_30], %84 {strides = array<i32>} : memref<112x32xbf16, #tpu.memory_space<vmem>>, vector<16x32xbf16>,
    %c2_i32 = arith.constant 2 : i32
    %c16_i32_31 = arith.constant 16 : i32
    %87 = arith.muli %c2_i32, %c16_i32_31 : i32
    %88 = tpu.assume_multiple %87, 16 : i32
    %89 = arith.index_cast %88 : i32 to index
    %c0_32 = arith.constant 0 : index
    %90 = vector.load %arg8[%89, %c0_32] : memref<112x128xbf16, #tpu.memory_space<vmem>>, vector<16x128xbf16>
    %cst_33 = arith.constant dense<0.000000e+00> : vector<16x128xf32>
    %91 = tpu.matmul %84, %11, %cst_33 {dimension_numbers = #tpu.dot_dimension_numbers<[1], [0], [0], [1], [0, 0, 1, 1], [], []>} : vector<16x32xbf16>, vector<32x128xbf16>, vector<16x128xf32> -> vector<16x128xf32>
    %92 = arith.extf %90 : vector<16x128xbf16> to vector<16x128xf32>
    %93 = arith.addf %92, %91 : vector<16x128xf32>
    %94 = vector.extract_strided_slice %93 {offsets = [0, 0], sizes = [16, 32], strides = [1, 1]} : vector<16x128xf32> to vector<16x32xf32>
    %95 = arith.negf %94 : vector<16x32xf32>
    %96 = math.exp %95 : vector<16x32xf32>
    %cst_34 = arith.constant 1.000000e+00 : f32
    %97 = vector.broadcast %cst_34 : f32 to vector<16x32xf32>
    %98 = arith.addf %97, %96 : vector<16x32xf32>
    %99 = arith.divf %97, %98 : vector<16x32xf32>
    %100 = vector.extract_strided_slice %93 {offsets = [0, 32], sizes = [16, 32], strides = [1, 1]} : vector<16x128xf32> to vector<16x32xf32>
    %101 = arith.negf %100 : vector<16x32xf32>
    %102 = math.exp %101 : vector<16x32xf32>
    %cst_35 = arith.constant 1.000000e+00 : f32
    %103 = vector.broadcast %cst_35 : f32 to vector<16x32xf32>
    %104 = arith.addf %103, %102 : vector<16x32xf32>
    %105 = arith.divf %103, %104 : vector<16x32xf32>
    %106 = vector.extract_strided_slice %93 {offsets = [0, 64], sizes = [16, 32], strides = [1, 1]} : vector<16x128xf32> to vector<16x32xf32>
    %107 = math.tanh %106 : vector<16x32xf32>
    %108 = vector.extract_strided_slice %93 {offsets = [0, 96], sizes = [16, 32], strides = [1, 1]} : vector<16x128xf32> to vector<16x32xf32>
    %109 = arith.negf %108 : vector<16x32xf32>
    %110 = math.exp %109 : vector<16x32xf32>
    %cst_36 = arith.constant 1.000000e+00 : f32
    %111 = vector.broadcast %cst_36 : f32 to vector<16x32xf32>
    %112 = arith.addf %111, %110 : vector<16x32xf32>
    %113 = arith.divf %111, %112 : vector<16x32xf32>
    %114 = arith.mulf %105, %81 : vector<16x32xf32>
    %115 = arith.mulf %99, %107 : vector<16x32xf32>
    %116 = arith.addf %114, %115 : vector<16x32xf32>
    %117 = math.tanh %116 : vector<16x32xf32>
    %118 = arith.mulf %113, %117 : vector<16x32xf32>
    %119 = arith.truncf %118 : vector<16x32xf32> to vector<16x32xbf16>
    %120 = arith.index_cast %88 : i32 to index
    %c0_37 = arith.constant 0 : index
    %121 = vector.load %arg7[%120, %c0_37] : memref<112x32xbf16, #tpu.memory_space<vmem>>, vector<16x32xbf16>
    tpu.vector_store %arg7[%120, %c0_37], %119 {strides = array<i32>} : memref<112x32xbf16, #tpu.memory_space<vmem>>, vector<16x32xbf16>,
    %c3_i32 = arith.constant 3 : i32
    %c16_i32_38 = arith.constant 16 : i32
    %122 = arith.muli %c3_i32, %c16_i32_38 : i32
    %123 = tpu.assume_multiple %122, 16 : i32
    %124 = arith.index_cast %123 : i32 to index
    %c0_39 = arith.constant 0 : index
    %125 = vector.load %arg8[%124, %c0_39] : memref<112x128xbf16, #tpu.memory_space<vmem>>, vector<16x128xbf16>
    %cst_40 = arith.constant dense<0.000000e+00> : vector<16x128xf32>
    %126 = tpu.matmul %119, %11, %cst_40 {dimension_numbers = #tpu.dot_dimension_numbers<[1], [0], [0], [1], [0, 0, 1, 1], [], []>} : vector<16x32xbf16>, vector<32x128xbf16>, vector<16x128xf32> -> vector<16x128xf32>
    %127 = arith.extf %125 : vector<16x128xbf16> to vector<16x128xf32>
    %128 = arith.addf %127, %126 : vector<16x128xf32>
    %129 = vector.extract_strided_slice %128 {offsets = [0, 0], sizes = [16, 32], strides = [1, 1]} : vector<16x128xf32> to vector<16x32xf32>
    %130 = arith.negf %129 : vector<16x32xf32>
    %131 = math.exp %130 : vector<16x32xf32>
    %cst_41 = arith.constant 1.000000e+00 : f32
    %132 = vector.broadcast %cst_41 : f32 to vector<16x32xf32>
    %133 = arith.addf %132, %131 : vector<16x32xf32>
    %134 = arith.divf %132, %133 : vector<16x32xf32>
    %135 = vector.extract_strided_slice %128 {offsets = [0, 32], sizes = [16, 32], strides = [1, 1]} : vector<16x128xf32> to vector<16x32xf32>
    %136 = arith.negf %135 : vector<16x32xf32>
    %137 = math.exp %136 : vector<16x32xf32>
    %cst_42 = arith.constant 1.000000e+00 : f32
    %138 = vector.broadcast %cst_42 : f32 to vector<16x32xf32>
    %139 = arith.addf %138, %137 : vector<16x32xf32>
    %140 = arith.divf %138, %139 : vector<16x32xf32>
    %141 = vector.extract_strided_slice %128 {offsets = [0, 64], sizes = [16, 32], strides = [1, 1]} : vector<16x128xf32> to vector<16x32xf32>
    %142 = math.tanh %141 : vector<16x32xf32>
    %143 = vector.extract_strided_slice %128 {offsets = [0, 96], sizes = [16, 32], strides = [1, 1]} : vector<16x128xf32> to vector<16x32xf32>
    %144 = arith.negf %143 : vector<16x32xf32>
    %145 = math.exp %144 : vector<16x32xf32>
    %cst_43 = arith.constant 1.000000e+00 : f32
    %146 = vector.broadcast %cst_43 : f32 to vector<16x32xf32>
    %147 = arith.addf %146, %145 : vector<16x32xf32>
    %148 = arith.divf %146, %147 : vector<16x32xf32>
    %149 = arith.mulf %140, %116 : vector<16x32xf32>
    %150 = arith.mulf %134, %142 : vector<16x32xf32>
    %151 = arith.addf %149, %150 : vector<16x32xf32>
    %152 = math.tanh %151 : vector<16x32xf32>
    %153 = arith.mulf %148, %152 : vector<16x32xf32>
    %154 = arith.truncf %153 : vector<16x32xf32> to vector<16x32xbf16>
    %155 = arith.index_cast %123 : i32 to index
    %c0_44 = arith.constant 0 : index
    %156 = vector.load %arg7[%155, %c0_44] : memref<112x32xbf16, #tpu.memory_space<vmem>>, vector<16x32xbf16>
    tpu.vector_store %arg7[%155, %c0_44], %154 {strides = array<i32>} : memref<112x32xbf16, #tpu.memory_space<vmem>>, vector<16x32xbf16>,
    %c4_i32 = arith.constant 4 : i32
    %c16_i32_45 = arith.constant 16 : i32
    %157 = arith.muli %c4_i32, %c16_i32_45 : i32
    %158 = tpu.assume_multiple %157, 16 : i32
    %159 = arith.index_cast %158 : i32 to index
    %c0_46 = arith.constant 0 : index
    %160 = vector.load %arg8[%159, %c0_46] : memref<112x128xbf16, #tpu.memory_space<vmem>>, vector<16x128xbf16>
    %cst_47 = arith.constant dense<0.000000e+00> : vector<16x128xf32>
    %161 = tpu.matmul %154, %11, %cst_47 {dimension_numbers = #tpu.dot_dimension_numbers<[1], [0], [0], [1], [0, 0, 1, 1], [], []>} : vector<16x32xbf16>, vector<32x128xbf16>, vector<16x128xf32> -> vector<16x128xf32>
    %162 = arith.extf %160 : vector<16x128xbf16> to vector<16x128xf32>
    %163 = arith.addf %162, %161 : vector<16x128xf32>
    %164 = vector.extract_strided_slice %163 {offsets = [0, 0], sizes = [16, 32], strides = [1, 1]} : vector<16x128xf32> to vector<16x32xf32>
    %165 = arith.negf %164 : vector<16x32xf32>
    %166 = math.exp %165 : vector<16x32xf32>
    %cst_48 = arith.constant 1.000000e+00 : f32
    %167 = vector.broadcast %cst_48 : f32 to vector<16x32xf32>
    %168 = arith.addf %167, %166 : vector<16x32xf32>
    %169 = arith.divf %167, %168 : vector<16x32xf32>
    %170 = vector.extract_strided_slice %163 {offsets = [0, 32], sizes = [16, 32], strides = [1, 1]} : vector<16x128xf32> to vector<16x32xf32>
    %171 = arith.negf %170 : vector<16x32xf32>
    %172 = math.exp %171 : vector<16x32xf32>
    %cst_49 = arith.constant 1.000000e+00 : f32
    %173 = vector.broadcast %cst_49 : f32 to vector<16x32xf32>
    %174 = arith.addf %173, %172 : vector<16x32xf32>
    %175 = arith.divf %173, %174 : vector<16x32xf32>
    %176 = vector.extract_strided_slice %163 {offsets = [0, 64], sizes = [16, 32], strides = [1, 1]} : vector<16x128xf32> to vector<16x32xf32>
    %177 = math.tanh %176 : vector<16x32xf32>
    %178 = vector.extract_strided_slice %163 {offsets = [0, 96], sizes = [16, 32], strides = [1, 1]} : vector<16x128xf32> to vector<16x32xf32>
    %179 = arith.negf %178 : vector<16x32xf32>
    %180 = math.exp %179 : vector<16x32xf32>
    %cst_50 = arith.constant 1.000000e+00 : f32
    %181 = vector.broadcast %cst_50 : f32 to vector<16x32xf32>
    %182 = arith.addf %181, %180 : vector<16x32xf32>
    %183 = arith.divf %181, %182 : vector<16x32xf32>
    %184 = arith.mulf %175, %151 : vector<16x32xf32>
    %185 = arith.mulf %169, %177 : vector<16x32xf32>
    %186 = arith.addf %184, %185 : vector<16x32xf32>
    %187 = math.tanh %186 : vector<16x32xf32>
    %188 = arith.mulf %183, %187 : vector<16x32xf32>
    %189 = arith.truncf %188 : vector<16x32xf32> to vector<16x32xbf16>
    %190 = arith.index_cast %158 : i32 to index
    %c0_51 = arith.constant 0 : index
    %191 = vector.load %arg7[%190, %c0_51] : memref<112x32xbf16, #tpu.memory_space<vmem>>, vector<16x32xbf16>
    tpu.vector_store %arg7[%190, %c0_51], %189 {strides = array<i32>} : memref<112x32xbf16, #tpu.memory_space<vmem>>, vector<16x32xbf16>,
    %c5_i32 = arith.constant 5 : i32
    %c16_i32_52 = arith.constant 16 : i32
    %192 = arith.muli %c5_i32, %c16_i32_52 : i32
    %193 = tpu.assume_multiple %192, 16 : i32
    %194 = arith.index_cast %193 : i32 to index
    %c0_53 = arith.constant 0 : index
    %195 = vector.load %arg8[%194, %c0_53] : memref<112x128xbf16, #tpu.memory_space<vmem>>, vector<16x128xbf16>
    %cst_54 = arith.constant dense<0.000000e+00> : vector<16x128xf32>
    %196 = tpu.matmul %189, %11, %cst_54 {dimension_numbers = #tpu.dot_dimension_numbers<[1], [0], [0], [1], [0, 0, 1, 1], [], []>} : vector<16x32xbf16>, vector<32x128xbf16>, vector<16x128xf32> -> vector<16x128xf32>
    %197 = arith.extf %195 : vector<16x128xbf16> to vector<16x128xf32>
    %198 = arith.addf %197, %196 : vector<16x128xf32>
    %199 = vector.extract_strided_slice %198 {offsets = [0, 0], sizes = [16, 32], strides = [1, 1]} : vector<16x128xf32> to vector<16x32xf32>
    %200 = arith.negf %199 : vector<16x32xf32>
    %201 = math.exp %200 : vector<16x32xf32>
    %cst_55 = arith.constant 1.000000e+00 : f32
    %202 = vector.broadcast %cst_55 : f32 to vector<16x32xf32>
    %203 = arith.addf %202, %201 : vector<16x32xf32>
    %204 = arith.divf %202, %203 : vector<16x32xf32>
    %205 = vector.extract_strided_slice %198 {offsets = [0, 32], sizes = [16, 32], strides = [1, 1]} : vector<16x128xf32> to vector<16x32xf32>
    %206 = arith.negf %205 : vector<16x32xf32>
    %207 = math.exp %206 : vector<16x32xf32>
    %cst_56 = arith.constant 1.000000e+00 : f32
    %208 = vector.broadcast %cst_56 : f32 to vector<16x32xf32>
    %209 = arith.addf %208, %207 : vector<16x32xf32>
    %210 = arith.divf %208, %209 : vector<16x32xf32>
    %211 = vector.extract_strided_slice %198 {offsets = [0, 64], sizes = [16, 32], strides = [1, 1]} : vector<16x128xf32> to vector<16x32xf32>
    %212 = math.tanh %211 : vector<16x32xf32>
    %213 = vector.extract_strided_slice %198 {offsets = [0, 96], sizes = [16, 32], strides = [1, 1]} : vector<16x128xf32> to vector<16x32xf32>
    %214 = arith.negf %213 : vector<16x32xf32>
    %215 = math.exp %214 : vector<16x32xf32>
    %cst_57 = arith.constant 1.000000e+00 : f32
    %216 = vector.broadcast %cst_57 : f32 to vector<16x32xf32>
    %217 = arith.addf %216, %215 : vector<16x32xf32>
    %218 = arith.divf %216, %217 : vector<16x32xf32>
    %219 = arith.mulf %210, %186 : vector<16x32xf32>
    %220 = arith.mulf %204, %212 : vector<16x32xf32>
    %221 = arith.addf %219, %220 : vector<16x32xf32>
    %222 = math.tanh %221 : vector<16x32xf32>
    %223 = arith.mulf %218, %222 : vector<16x32xf32>
    %224 = arith.truncf %223 : vector<16x32xf32> to vector<16x32xbf16>
    %225 = arith.index_cast %193 : i32 to index
    %c0_58 = arith.constant 0 : index
    %226 = vector.load %arg7[%225, %c0_58] : memref<112x32xbf16, #tpu.memory_space<vmem>>, vector<16x32xbf16>
    tpu.vector_store %arg7[%225, %c0_58], %224 {strides = array<i32>} : memref<112x32xbf16, #tpu.memory_space<vmem>>, vector<16x32xbf16>,
    %c6_i32 = arith.constant 6 : i32
    %c16_i32_59 = arith.constant 16 : i32
    %227 = arith.muli %c6_i32, %c16_i32_59 : i32
    %228 = tpu.assume_multiple %227, 16 : i32
    %229 = arith.index_cast %228 : i32 to index
    %c0_60 = arith.constant 0 : index
    %230 = vector.load %arg8[%229, %c0_60] : memref<112x128xbf16, #tpu.memory_space<vmem>>, vector<16x128xbf16>
    %cst_61 = arith.constant dense<0.000000e+00> : vector<16x128xf32>
    %231 = tpu.matmul %224, %11, %cst_61 {dimension_numbers = #tpu.dot_dimension_numbers<[1], [0], [0], [1], [0, 0, 1, 1], [], []>} : vector<16x32xbf16>, vector<32x128xbf16>, vector<16x128xf32> -> vector<16x128xf32>
    %232 = arith.extf %230 : vector<16x128xbf16> to vector<16x128xf32>
    %233 = arith.addf %232, %231 : vector<16x128xf32>
    %234 = vector.extract_strided_slice %233 {offsets = [0, 0], sizes = [16, 32], strides = [1, 1]} : vector<16x128xf32> to vector<16x32xf32>
    %235 = arith.negf %234 : vector<16x32xf32>
    %236 = math.exp %235 : vector<16x32xf32>
    %cst_62 = arith.constant 1.000000e+00 : f32
    %237 = vector.broadcast %cst_62 : f32 to vector<16x32xf32>
    %238 = arith.addf %237, %236 : vector<16x32xf32>
    %239 = arith.divf %237, %238 : vector<16x32xf32>
    %240 = vector.extract_strided_slice %233 {offsets = [0, 32], sizes = [16, 32], strides = [1, 1]} : vector<16x128xf32> to vector<16x32xf32>
    %241 = arith.negf %240 : vector<16x32xf32>
    %242 = math.exp %241 : vector<16x32xf32>
    %cst_63 = arith.constant 1.000000e+00 : f32
    %243 = vector.broadcast %cst_63 : f32 to vector<16x32xf32>
    %244 = arith.addf %243, %242 : vector<16x32xf32>
    %245 = arith.divf %243, %244 : vector<16x32xf32>
    %246 = vector.extract_strided_slice %233 {offsets = [0, 64], sizes = [16, 32], strides = [1, 1]} : vector<16x128xf32> to vector<16x32xf32>
    %247 = math.tanh %246 : vector<16x32xf32>
    %248 = vector.extract_strided_slice %233 {offsets = [0, 96], sizes = [16, 32], strides = [1, 1]} : vector<16x128xf32> to vector<16x32xf32>
    %249 = arith.negf %248 : vector<16x32xf32>
    %250 = math.exp %249 : vector<16x32xf32>
    %cst_64 = arith.constant 1.000000e+00 : f32
    %251 = vector.broadcast %cst_64 : f32 to vector<16x32xf32>
    %252 = arith.addf %251, %250 : vector<16x32xf32>
    %253 = arith.divf %251, %252 : vector<16x32xf32>
    %254 = arith.mulf %245, %221 : vector<16x32xf32>
    %255 = arith.mulf %239, %247 : vector<16x32xf32>
    %256 = arith.addf %254, %255 : vector<16x32xf32>
    %257 = math.tanh %256 : vector<16x32xf32>
    %258 = arith.mulf %253, %257 : vector<16x32xf32>
    %259 = arith.truncf %258 : vector<16x32xf32> to vector<16x32xbf16>
    %260 = arith.index_cast %228 : i32 to index
    %c0_65 = arith.constant 0 : index
    %261 = vector.load %arg7[%260, %c0_65] : memref<112x32xbf16, #tpu.memory_space<vmem>>, vector<16x32xbf16>
    tpu.vector_store %arg7[%260, %c0_65], %259 {strides = array<i32>} : memref<112x32xbf16, #tpu.memory_space<vmem>>, vector<16x32xbf16>,
    %c7_i32 = arith.constant 7 : i32
    %c0_66 = arith.constant 0 : index
    %c0_67 = arith.constant 0 : index
    %262 = vector.load %arg7[%c0_66, %c0_67] : memref<112x32xbf16, #tpu.memory_space<vmem>>, vector<112x32xbf16>
    %c1 = arith.constant 1 : index
    %c0_68 = arith.constant 0 : index
    %c0_69 = arith.constant 0 : index
    %263 = vector.load %arg1[%c1, %c0_68, %c0_69] : memref<2x32x128xbf16, #tpu.memory_space<vmem>>, vector<1x32x128xbf16>
    %264 = vector.shape_cast %263 : vector<1x32x128xbf16> to vector<32x128xbf16>
    %cst_70 = arith.constant dense<0.000000e+00> : vector<112x128xf32>
    %265 = tpu.matmul %262, %264, %cst_70 {dimension_numbers = #tpu.dot_dimension_numbers<[1], [0], [0], [1], [0, 0, 1, 1], [], []>} : vector<112x32xbf16>, vector<32x128xbf16>, vector<112x128xf32> -> vector<112x128xf32>
    %c1_71 = arith.constant 1 : index
    %c0_72 = arith.constant 0 : index
    %c0_73 = arith.constant 0 : index
    %266 = vector.load %arg3[%c1_71, %c0_72, %c0_73] : memref<2x1x128xf32, #tpu.memory_space<vmem>>, vector<1x1x128xf32>
    %267 = vector.shape_cast %266 : vector<1x1x128xf32> to vector<1x128xf32>
    %268 = vector.broadcast %267 : vector<1x128xf32> to vector<112x128xf32>
    %269 = arith.addf %265, %268 : vector<112x128xf32>
    %270 = arith.truncf %269 : vector<112x128xf32> to vector<112x128xbf16>
    %c0_74 = arith.constant 0 : index
    %c0_75 = arith.constant 0 : index
    %271 = vector.load %arg8[%c0_74, %c0_75] : memref<112x128xbf16, #tpu.memory_space<vmem>>, vector<112x128xbf16>
    tpu.vector_store %arg8[%c0_74, %c0_75], %270 {strides = array<i32>} : memref<112x128xbf16, #tpu.memory_space<vmem>>, vector<112x128xbf16>,
    %c1_76 = arith.constant 1 : index
    %c0_77 = arith.constant 0 : index
    %c0_78 = arith.constant 0 : index
    %272 = vector.load %arg2[%c1_76, %c0_77, %c0_78] : memref<2x32x128xbf16, #tpu.memory_space<vmem>>, vector<1x32x128xbf16>
    %273 = vector.shape_cast %272 : vector<1x32x128xbf16> to vector<32x128xbf16>
    %c1_79 = arith.constant 1 : index
    %c0_80 = arith.constant 0 : index
    %c0_81 = arith.constant 0 : index
    %274 = vector.load %arg4[%c1_79, %c0_80, %c0_81] : memref<2x16x32xf32, #tpu.memory_space<vmem>>, vector<1x16x32xf32>
    %275 = vector.shape_cast %274 : vector<1x16x32xf32> to vector<16x32xf32>
    %276 = arith.truncf %275 : vector<16x32xf32> to vector<16x32xbf16>
    %c1_82 = arith.constant 1 : index
    %c0_83 = arith.constant 0 : index
    %c0_84 = arith.constant 0 : index
    %277 = vector.load %arg5[%c1_82, %c0_83, %c0_84] : memref<2x16x32xf32, #tpu.memory_space<vmem>>, vector<1x16x32xf32>
    %278 = vector.shape_cast %277 : vector<1x16x32xf32> to vector<16x32xf32>
    %c0_i32_85 = arith.constant 0 : i32
    %c16_i32_86 = arith.constant 16 : i32
    %279 = arith.muli %c0_i32_85, %c16_i32_86 : i32
    %280 = tpu.assume_multiple %279, 16 : i32
    %281 = arith.index_cast %280 : i32 to index
    %c0_87 = arith.constant 0 : index
    %282 = vector.load %arg8[%281, %c0_87] : memref<112x128xbf16, #tpu.memory_space<vmem>>, vector<16x128xbf16>
    %cst_88 = arith.constant dense<0.000000e+00> : vector<16x128xf32>
    %283 = tpu.matmul %276, %273, %cst_88 {dimension_numbers = #tpu.dot_dimension_numbers<[1], [0], [0], [1], [0, 0, 1, 1], [], []>} : vector<16x32xbf16>, vector<32x128xbf16>, vector<16x128xf32> -> vector<16x128xf32>
    %284 = arith.extf %282 : vector<16x128xbf16> to vector<16x128xf32>
    %285 = arith.addf %284, %283 : vector<16x128xf32>
    %286 = vector.extract_strided_slice %285 {offsets = [0, 0], sizes = [16, 32], strides = [1, 1]} : vector<16x128xf32> to vector<16x32xf32>
    %287 = arith.negf %286 : vector<16x32xf32>
    %288 = math.exp %287 : vector<16x32xf32>
    %cst_89 = arith.constant 1.000000e+00 : f32
    %289 = vector.broadcast %cst_89 : f32 to vector<16x32xf32>
    %290 = arith.addf %289, %288 : vector<16x32xf32>
    %291 = arith.divf %289, %290 : vector<16x32xf32>
    %292 = vector.extract_strided_slice %285 {offsets = [0, 32], sizes = [16, 32], strides = [1, 1]} : vector<16x128xf32> to vector<16x32xf32>
    %293 = arith.negf %292 : vector<16x32xf32>
    %294 = math.exp %293 : vector<16x32xf32>
    %cst_90 = arith.constant 1.000000e+00 : f32
    %295 = vector.broadcast %cst_90 : f32 to vector<16x32xf32>
    %296 = arith.addf %295, %294 : vector<16x32xf32>
    %297 = arith.divf %295, %296 : vector<16x32xf32>
    %298 = vector.extract_strided_slice %285 {offsets = [0, 64], sizes = [16, 32], strides = [1, 1]} : vector<16x128xf32> to vector<16x32xf32>
    %299 = math.tanh %298 : vector<16x32xf32>
    %300 = vector.extract_strided_slice %285 {offsets = [0, 96], sizes = [16, 32], strides = [1, 1]} : vector<16x128xf32> to vector<16x32xf32>
    %301 = arith.negf %300 : vector<16x32xf32>
    %302 = math.exp %301 : vector<16x32xf32>
    %cst_91 = arith.constant 1.000000e+00 : f32
    %303 = vector.broadcast %cst_91 : f32 to vector<16x32xf32>
    %304 = arith.addf %303, %302 : vector<16x32xf32>
    %305 = arith.divf %303, %304 : vector<16x32xf32>
    %306 = arith.mulf %297, %278 : vector<16x32xf32>
    %307 = arith.mulf %291, %299 : vector<16x32xf32>
    %308 = arith.addf %306, %307 : vector<16x32xf32>
    %309 = math.tanh %308 : vector<16x32xf32>
    %310 = arith.mulf %305, %309 : vector<16x32xf32>
    %311 = arith.truncf %310 : vector<16x32xf32> to vector<16x32xbf16>
    %312 = arith.index_cast %280 : i32 to index
    %c0_92 = arith.constant 0 : index
    %313 = vector.load %arg6[%312, %c0_92] : memref<112x32xbf16, #tpu.memory_space<vmem>>, vector<16x32xbf16>
    tpu.vector_store %arg6[%312, %c0_92], %311 {strides = array<i32>} : memref<112x32xbf16, #tpu.memory_space<vmem>>, vector<16x32xbf16>,
    %c1_i32_93 = arith.constant 1 : i32
    %c16_i32_94 = arith.constant 16 : i32
    %314 = arith.muli %c1_i32_93, %c16_i32_94 : i32
    %315 = tpu.assume_multiple %314, 16 : i32
    %316 = arith.index_cast %315 : i32 to index
    %c0_95 = arith.constant 0 : index
    %317 = vector.load %arg8[%316, %c0_95] : memref<112x128xbf16, #tpu.memory_space<vmem>>, vector<16x128xbf16>
    %cst_96 = arith.constant dense<0.000000e+00> : vector<16x128xf32>
    %318 = tpu.matmul %311, %273, %cst_96 {dimension_numbers = #tpu.dot_dimension_numbers<[1], [0], [0], [1], [0, 0, 1, 1], [], []>} : vector<16x32xbf16>, vector<32x128xbf16>, vector<16x128xf32> -> vector<16x128xf32>
    %319 = arith.extf %317 : vector<16x128xbf16> to vector<16x128xf32>
    %320 = arith.addf %319, %318 : vector<16x128xf32>
    %321 = vector.extract_strided_slice %320 {offsets = [0, 0], sizes = [16, 32], strides = [1, 1]} : vector<16x128xf32> to vector<16x32xf32>
    %322 = arith.negf %321 : vector<16x32xf32>
    %323 = math.exp %322 : vector<16x32xf32>
    %cst_97 = arith.constant 1.000000e+00 : f32
    %324 = vector.broadcast %cst_97 : f32 to vector<16x32xf32>
    %325 = arith.addf %324, %323 : vector<16x32xf32>
    %326 = arith.divf %324, %325 : vector<16x32xf32>
    %327 = vector.extract_strided_slice %320 {offsets = [0, 32], sizes = [16, 32], strides = [1, 1]} : vector<16x128xf32> to vector<16x32xf32>
    %328 = arith.negf %327 : vector<16x32xf32>
    %329 = math.exp %328 : vector<16x32xf32>
    %cst_98 = arith.constant 1.000000e+00 : f32
    %330 = vector.broadcast %cst_98 : f32 to vector<16x32xf32>
    %331 = arith.addf %330, %329 : vector<16x32xf32>
    %332 = arith.divf %330, %331 : vector<16x32xf32>
    %333 = vector.extract_strided_slice %320 {offsets = [0, 64], sizes = [16, 32], strides = [1, 1]} : vector<16x128xf32> to vector<16x32xf32>
    %334 = math.tanh %333 : vector<16x32xf32>
    %335 = vector.extract_strided_slice %320 {offsets = [0, 96], sizes = [16, 32], strides = [1, 1]} : vector<16x128xf32> to vector<16x32xf32>
    %336 = arith.negf %335 : vector<16x32xf32>
    %337 = math.exp %336 : vector<16x32xf32>
    %cst_99 = arith.constant 1.000000e+00 : f32
    %338 = vector.broadcast %cst_99 : f32 to vector<16x32xf32>
    %339 = arith.addf %338, %337 : vector<16x32xf32>
    %340 = arith.divf %338, %339 : vector<16x32xf32>
    %341 = arith.mulf %332, %308 : vector<16x32xf32>
    %342 = arith.mulf %326, %334 : vector<16x32xf32>
    %343 = arith.addf %341, %342 : vector<16x32xf32>
    %344 = math.tanh %343 : vector<16x32xf32>
    %345 = arith.mulf %340, %344 : vector<16x32xf32>
    %346 = arith.truncf %345 : vector<16x32xf32> to vector<16x32xbf16>
    %347 = arith.index_cast %315 : i32 to index
    %c0_100 = arith.constant 0 : index
    %348 = vector.load %arg6[%347, %c0_100] : memref<112x32xbf16, #tpu.memory_space<vmem>>, vector<16x32xbf16>
    tpu.vector_store %arg6[%347, %c0_100], %346 {strides = array<i32>} : memref<112x32xbf16, #tpu.memory_space<vmem>>, vector<16x32xbf16>,
    %c2_i32_101 = arith.constant 2 : i32
    %c16_i32_102 = arith.constant 16 : i32
    %349 = arith.muli %c2_i32_101, %c16_i32_102 : i32
    %350 = tpu.assume_multiple %349, 16 : i32
    %351 = arith.index_cast %350 : i32 to index
    %c0_103 = arith.constant 0 : index
    %352 = vector.load %arg8[%351, %c0_103] : memref<112x128xbf16, #tpu.memory_space<vmem>>, vector<16x128xbf16>
    %cst_104 = arith.constant dense<0.000000e+00> : vector<16x128xf32>
    %353 = tpu.matmul %346, %273, %cst_104 {dimension_numbers = #tpu.dot_dimension_numbers<[1], [0], [0], [1], [0, 0, 1, 1], [], []>} : vector<16x32xbf16>, vector<32x128xbf16>, vector<16x128xf32> -> vector<16x128xf32>
    %354 = arith.extf %352 : vector<16x128xbf16> to vector<16x128xf32>
    %355 = arith.addf %354, %353 : vector<16x128xf32>
    %356 = vector.extract_strided_slice %355 {offsets = [0, 0], sizes = [16, 32], strides = [1, 1]} : vector<16x128xf32> to vector<16x32xf32>
    %357 = arith.negf %356 : vector<16x32xf32>
    %358 = math.exp %357 : vector<16x32xf32>
    %cst_105 = arith.constant 1.000000e+00 : f32
    %359 = vector.broadcast %cst_105 : f32 to vector<16x32xf32>
    %360 = arith.addf %359, %358 : vector<16x32xf32>
    %361 = arith.divf %359, %360 : vector<16x32xf32>
    %362 = vector.extract_strided_slice %355 {offsets = [0, 32], sizes = [16, 32], strides = [1, 1]} : vector<16x128xf32> to vector<16x32xf32>
    %363 = arith.negf %362 : vector<16x32xf32>
    %364 = math.exp %363 : vector<16x32xf32>
    %cst_106 = arith.constant 1.000000e+00 : f32
    %365 = vector.broadcast %cst_106 : f32 to vector<16x32xf32>
    %366 = arith.addf %365, %364 : vector<16x32xf32>
    %367 = arith.divf %365, %366 : vector<16x32xf32>
    %368 = vector.extract_strided_slice %355 {offsets = [0, 64], sizes = [16, 32], strides = [1, 1]} : vector<16x128xf32> to vector<16x32xf32>
    %369 = math.tanh %368 : vector<16x32xf32>
    %370 = vector.extract_strided_slice %355 {offsets = [0, 96], sizes = [16, 32], strides = [1, 1]} : vector<16x128xf32> to vector<16x32xf32>
    %371 = arith.negf %370 : vector<16x32xf32>
    %372 = math.exp %371 : vector<16x32xf32>
    %cst_107 = arith.constant 1.000000e+00 : f32
    %373 = vector.broadcast %cst_107 : f32 to vector<16x32xf32>
    %374 = arith.addf %373, %372 : vector<16x32xf32>
    %375 = arith.divf %373, %374 : vector<16x32xf32>
    %376 = arith.mulf %367, %343 : vector<16x32xf32>
    %377 = arith.mulf %361, %369 : vector<16x32xf32>
    %378 = arith.addf %376, %377 : vector<16x32xf32>
    %379 = math.tanh %378 : vector<16x32xf32>
    %380 = arith.mulf %375, %379 : vector<16x32xf32>
    %381 = arith.truncf %380 : vector<16x32xf32> to vector<16x32xbf16>
    %382 = arith.index_cast %350 : i32 to index
    %c0_108 = arith.constant 0 : index
    %383 = vector.load %arg6[%382, %c0_108] : memref<112x32xbf16, #tpu.memory_space<vmem>>, vector<16x32xbf16>
    tpu.vector_store %arg6[%382, %c0_108], %381 {strides = array<i32>} : memref<112x32xbf16, #tpu.memory_space<vmem>>, vector<16x32xbf16>,
    %c3_i32_109 = arith.constant 3 : i32
    %c16_i32_110 = arith.constant 16 : i32
    %384 = arith.muli %c3_i32_109, %c16_i32_110 : i32
    %385 = tpu.assume_multiple %384, 16 : i32
    %386 = arith.index_cast %385 : i32 to index
    %c0_111 = arith.constant 0 : index
    %387 = vector.load %arg8[%386, %c0_111] : memref<112x128xbf16, #tpu.memory_space<vmem>>, vector<16x128xbf16>
    %cst_112 = arith.constant dense<0.000000e+00> : vector<16x128xf32>
    %388 = tpu.matmul %381, %273, %cst_112 {dimension_numbers = #tpu.dot_dimension_numbers<[1], [0], [0], [1], [0, 0, 1, 1], [], []>} : vector<16x32xbf16>, vector<32x128xbf16>, vector<16x128xf32> -> vector<16x128xf32>
    %389 = arith.extf %387 : vector<16x128xbf16> to vector<16x128xf32>
    %390 = arith.addf %389, %388 : vector<16x128xf32>
    %391 = vector.extract_strided_slice %390 {offsets = [0, 0], sizes = [16, 32], strides = [1, 1]} : vector<16x128xf32> to vector<16x32xf32>
    %392 = arith.negf %391 : vector<16x32xf32>
    %393 = math.exp %392 : vector<16x32xf32>
    %cst_113 = arith.constant 1.000000e+00 : f32
    %394 = vector.broadcast %cst_113 : f32 to vector<16x32xf32>
    %395 = arith.addf %394, %393 : vector<16x32xf32>
    %396 = arith.divf %394, %395 : vector<16x32xf32>
    %397 = vector.extract_strided_slice %390 {offsets = [0, 32], sizes = [16, 32], strides = [1, 1]} : vector<16x128xf32> to vector<16x32xf32>
    %398 = arith.negf %397 : vector<16x32xf32>
    %399 = math.exp %398 : vector<16x32xf32>
    %cst_114 = arith.constant 1.000000e+00 : f32
    %400 = vector.broadcast %cst_114 : f32 to vector<16x32xf32>
    %401 = arith.addf %400, %399 : vector<16x32xf32>
    %402 = arith.divf %400, %401 : vector<16x32xf32>
    %403 = vector.extract_strided_slice %390 {offsets = [0, 64], sizes = [16, 32], strides = [1, 1]} : vector<16x128xf32> to vector<16x32xf32>
    %404 = math.tanh %403 : vector<16x32xf32>
    %405 = vector.extract_strided_slice %390 {offsets = [0, 96], sizes = [16, 32], strides = [1, 1]} : vector<16x128xf32> to vector<16x32xf32>
    %406 = arith.negf %405 : vector<16x32xf32>
    %407 = math.exp %406 : vector<16x32xf32>
    %cst_115 = arith.constant 1.000000e+00 : f32
    %408 = vector.broadcast %cst_115 : f32 to vector<16x32xf32>
    %409 = arith.addf %408, %407 : vector<16x32xf32>
    %410 = arith.divf %408, %409 : vector<16x32xf32>
    %411 = arith.mulf %402, %378 : vector<16x32xf32>
    %412 = arith.mulf %396, %404 : vector<16x32xf32>
    %413 = arith.addf %411, %412 : vector<16x32xf32>
    %414 = math.tanh %413 : vector<16x32xf32>
    %415 = arith.mulf %410, %414 : vector<16x32xf32>
    %416 = arith.truncf %415 : vector<16x32xf32> to vector<16x32xbf16>
    %417 = arith.index_cast %385 : i32 to index
    %c0_116 = arith.constant 0 : index
    %418 = vector.load %arg6[%417, %c0_116] : memref<112x32xbf16, #tpu.memory_space<vmem>>, vector<16x32xbf16>
    tpu.vector_store %arg6[%417, %c0_116], %416 {strides = array<i32>} : memref<112x32xbf16, #tpu.memory_space<vmem>>, vector<16x32xbf16>,
    %c4_i32_117 = arith.constant 4 : i32
    %c16_i32_118 = arith.constant 16 : i32
    %419 = arith.muli %c4_i32_117, %c16_i32_118 : i32
    %420 = tpu.assume_multiple %419, 16 : i32
    %421 = arith.index_cast %420 : i32 to index
    %c0_119 = arith.constant 0 : index
    %422 = vector.load %arg8[%421, %c0_119] : memref<112x128xbf16, #tpu.memory_space<vmem>>, vector<16x128xbf16>
    %cst_120 = arith.constant dense<0.000000e+00> : vector<16x128xf32>
    %423 = tpu.matmul %416, %273, %cst_120 {dimension_numbers = #tpu.dot_dimension_numbers<[1], [0], [0], [1], [0, 0, 1, 1], [], []>} : vector<16x32xbf16>, vector<32x128xbf16>, vector<16x128xf32> -> vector<16x128xf32>
    %424 = arith.extf %422 : vector<16x128xbf16> to vector<16x128xf32>
    %425 = arith.addf %424, %423 : vector<16x128xf32>
    %426 = vector.extract_strided_slice %425 {offsets = [0, 0], sizes = [16, 32], strides = [1, 1]} : vector<16x128xf32> to vector<16x32xf32>
    %427 = arith.negf %426 : vector<16x32xf32>
    %428 = math.exp %427 : vector<16x32xf32>
    %cst_121 = arith.constant 1.000000e+00 : f32
    %429 = vector.broadcast %cst_121 : f32 to vector<16x32xf32>
    %430 = arith.addf %429, %428 : vector<16x32xf32>
    %431 = arith.divf %429, %430 : vector<16x32xf32>
    %432 = vector.extract_strided_slice %425 {offsets = [0, 32], sizes = [16, 32], strides = [1, 1]} : vector<16x128xf32> to vector<16x32xf32>
    %433 = arith.negf %432 : vector<16x32xf32>
    %434 = math.exp %433 : vector<16x32xf32>
    %cst_122 = arith.constant 1.000000e+00 : f32
    %435 = vector.broadcast %cst_122 : f32 to vector<16x32xf32>
    %436 = arith.addf %435, %434 : vector<16x32xf32>
    %437 = arith.divf %435, %436 : vector<16x32xf32>
    %438 = vector.extract_strided_slice %425 {offsets = [0, 64], sizes = [16, 32], strides = [1, 1]} : vector<16x128xf32> to vector<16x32xf32>
    %439 = math.tanh %438 : vector<16x32xf32>
    %440 = vector.extract_strided_slice %425 {offsets = [0, 96], sizes = [16, 32], strides = [1, 1]} : vector<16x128xf32> to vector<16x32xf32>
    %441 = arith.negf %440 : vector<16x32xf32>
    %442 = math.exp %441 : vector<16x32xf32>
    %cst_123 = arith.constant 1.000000e+00 : f32
    %443 = vector.broadcast %cst_123 : f32 to vector<16x32xf32>
    %444 = arith.addf %443, %442 : vector<16x32xf32>
    %445 = arith.divf %443, %444 : vector<16x32xf32>
    %446 = arith.mulf %437, %413 : vector<16x32xf32>
    %447 = arith.mulf %431, %439 : vector<16x32xf32>
    %448 = arith.addf %446, %447 : vector<16x32xf32>
    %449 = math.tanh %448 : vector<16x32xf32>
    %450 = arith.mulf %445, %449 : vector<16x32xf32>
    %451 = arith.truncf %450 : vector<16x32xf32> to vector<16x32xbf16>
    %452 = arith.index_cast %420 : i32 to index
    %c0_124 = arith.constant 0 : index
    %453 = vector.load %arg6[%452, %c0_124] : memref<112x32xbf16, #tpu.memory_space<vmem>>, vector<16x32xbf16>
    tpu.vector_store %arg6[%452, %c0_124], %451 {strides = array<i32>} : memref<112x32xbf16, #tpu.memory_space<vmem>>, vector<16x32xbf16>,
    %c5_i32_125 = arith.constant 5 : i32
    %c16_i32_126 = arith.constant 16 : i32
    %454 = arith.muli %c5_i32_125, %c16_i32_126 : i32
    %455 = tpu.assume_multiple %454, 16 : i32
    %456 = arith.index_cast %455 : i32 to index
    %c0_127 = arith.constant 0 : index
    %457 = vector.load %arg8[%456, %c0_127] : memref<112x128xbf16, #tpu.memory_space<vmem>>, vector<16x128xbf16>
    %cst_128 = arith.constant dense<0.000000e+00> : vector<16x128xf32>
    %458 = tpu.matmul %451, %273, %cst_128 {dimension_numbers = #tpu.dot_dimension_numbers<[1], [0], [0], [1], [0, 0, 1, 1], [], []>} : vector<16x32xbf16>, vector<32x128xbf16>, vector<16x128xf32> -> vector<16x128xf32>
    %459 = arith.extf %457 : vector<16x128xbf16> to vector<16x128xf32>
    %460 = arith.addf %459, %458 : vector<16x128xf32>
    %461 = vector.extract_strided_slice %460 {offsets = [0, 0], sizes = [16, 32], strides = [1, 1]} : vector<16x128xf32> to vector<16x32xf32>
    %462 = arith.negf %461 : vector<16x32xf32>
    %463 = math.exp %462 : vector<16x32xf32>
    %cst_129 = arith.constant 1.000000e+00 : f32
    %464 = vector.broadcast %cst_129 : f32 to vector<16x32xf32>
    %465 = arith.addf %464, %463 : vector<16x32xf32>
    %466 = arith.divf %464, %465 : vector<16x32xf32>
    %467 = vector.extract_strided_slice %460 {offsets = [0, 32], sizes = [16, 32], strides = [1, 1]} : vector<16x128xf32> to vector<16x32xf32>
    %468 = arith.negf %467 : vector<16x32xf32>
    %469 = math.exp %468 : vector<16x32xf32>
    %cst_130 = arith.constant 1.000000e+00 : f32
    %470 = vector.broadcast %cst_130 : f32 to vector<16x32xf32>
    %471 = arith.addf %470, %469 : vector<16x32xf32>
    %472 = arith.divf %470, %471 : vector<16x32xf32>
    %473 = vector.extract_strided_slice %460 {offsets = [0, 64], sizes = [16, 32], strides = [1, 1]} : vector<16x128xf32> to vector<16x32xf32>
    %474 = math.tanh %473 : vector<16x32xf32>
    %475 = vector.extract_strided_slice %460 {offsets = [0, 96], sizes = [16, 32], strides = [1, 1]} : vector<16x128xf32> to vector<16x32xf32>
    %476 = arith.negf %475 : vector<16x32xf32>
    %477 = math.exp %476 : vector<16x32xf32>
    %cst_131 = arith.constant 1.000000e+00 : f32
    %478 = vector.broadcast %cst_131 : f32 to vector<16x32xf32>
    %479 = arith.addf %478, %477 : vector<16x32xf32>
    %480 = arith.divf %478, %479 : vector<16x32xf32>
    %481 = arith.mulf %472, %448 : vector<16x32xf32>
    %482 = arith.mulf %466, %474 : vector<16x32xf32>
    %483 = arith.addf %481, %482 : vector<16x32xf32>
    %484 = math.tanh %483 : vector<16x32xf32>
    %485 = arith.mulf %480, %484 : vector<16x32xf32>
    %486 = arith.truncf %485 : vector<16x32xf32> to vector<16x32xbf16>
    %487 = arith.index_cast %455 : i32 to index
    %c0_132 = arith.constant 0 : index
    %488 = vector.load %arg6[%487, %c0_132] : memref<112x32xbf16, #tpu.memory_space<vmem>>, vector<16x32xbf16>
    tpu.vector_store %arg6[%487, %c0_132], %486 {strides = array<i32>} : memref<112x32xbf16, #tpu.memory_space<vmem>>, vector<16x32xbf16>,
    %c6_i32_133 = arith.constant 6 : i32
    %c16_i32_134 = arith.constant 16 : i32
    %489 = arith.muli %c6_i32_133, %c16_i32_134 : i32
    %490 = tpu.assume_multiple %489, 16 : i32
    %491 = arith.index_cast %490 : i32 to index
    %c0_135 = arith.constant 0 : index
    %492 = vector.load %arg8[%491, %c0_135] : memref<112x128xbf16, #tpu.memory_space<vmem>>, vector<16x128xbf16>
    %cst_136 = arith.constant dense<0.000000e+00> : vector<16x128xf32>
    %493 = tpu.matmul %486, %273, %cst_136 {dimension_numbers = #tpu.dot_dimension_numbers<[1], [0], [0], [1], [0, 0, 1, 1], [], []>} : vector<16x32xbf16>, vector<32x128xbf16>, vector<16x128xf32> -> vector<16x128xf32>
    %494 = arith.extf %492 : vector<16x128xbf16> to vector<16x128xf32>
    %495 = arith.addf %494, %493 : vector<16x128xf32>
    %496 = vector.extract_strided_slice %495 {offsets = [0, 0], sizes = [16, 32], strides = [1, 1]} : vector<16x128xf32> to vector<16x32xf32>
    %497 = arith.negf %496 : vector<16x32xf32>
    %498 = math.exp %497 : vector<16x32xf32>
    %cst_137 = arith.constant 1.000000e+00 : f32
    %499 = vector.broadcast %cst_137 : f32 to vector<16x32xf32>
    %500 = arith.addf %499, %498 : vector<16x32xf32>
    %501 = arith.divf %499, %500 : vector<16x32xf32>
    %502 = vector.extract_strided_slice %495 {offsets = [0, 32], sizes = [16, 32], strides = [1, 1]} : vector<16x128xf32> to vector<16x32xf32>
    %503 = arith.negf %502 : vector<16x32xf32>
    %504 = math.exp %503 : vector<16x32xf32>
    %cst_138 = arith.constant 1.000000e+00 : f32
    %505 = vector.broadcast %cst_138 : f32 to vector<16x32xf32>
    %506 = arith.addf %505, %504 : vector<16x32xf32>
    %507 = arith.divf %505, %506 : vector<16x32xf32>
    %508 = vector.extract_strided_slice %495 {offsets = [0, 64], sizes = [16, 32], strides = [1, 1]} : vector<16x128xf32> to vector<16x32xf32>
    %509 = math.tanh %508 : vector<16x32xf32>
    %510 = vector.extract_strided_slice %495 {offsets = [0, 96], sizes = [16, 32], strides = [1, 1]} : vector<16x128xf32> to vector<16x32xf32>
    %511 = arith.negf %510 : vector<16x32xf32>
    %512 = math.exp %511 : vector<16x32xf32>
    %cst_139 = arith.constant 1.000000e+00 : f32
    %513 = vector.broadcast %cst_139 : f32 to vector<16x32xf32>
    %514 = arith.addf %513, %512 : vector<16x32xf32>
    %515 = arith.divf %513, %514 : vector<16x32xf32>
    %516 = arith.mulf %507, %483 : vector<16x32xf32>
    %517 = arith.mulf %501, %509 : vector<16x32xf32>
    %518 = arith.addf %516, %517 : vector<16x32xf32>
    %519 = math.tanh %518 : vector<16x32xf32>
    %520 = arith.mulf %515, %519 : vector<16x32xf32>
    %521 = arith.truncf %520 : vector<16x32xf32> to vector<16x32xbf16>
    %522 = arith.index_cast %490 : i32 to index
    %c0_140 = arith.constant 0 : index
    %523 = vector.load %arg6[%522, %c0_140] : memref<112x32xbf16, #tpu.memory_space<vmem>>, vector<16x32xbf16>
    tpu.vector_store %arg6[%522, %c0_140], %521 {strides = array<i32>} : memref<112x32xbf16, #tpu.memory_space<vmem>>, vector<16x32xbf16>,
    %c7_i32_141 = arith.constant 7 : i32
    return
  }
}

</mosaic_0001>

<bundles_post_ra>
// kernel: tpu_custom_call.1
= control target key start
LH: loop header
LB: loop body
LE: loop exit
PB: predicated region body
PF: predicated region fallthrough
CT: control target
= control target key end

     0   :  { %11 = vsyncpa [#allocation5], 0  ;;  %s3482_s0 = inlined_call_operand.hbm [shape: bf16[112,32], index: 0, kind: input, shape index: {}]   ;;  %s3483_s1 = inlined_call_operand.hbm [shape: bf16[2,32,128], index: 1, kind: input, shape index: {}]   ;;  %s3484_s2 = inlined_call_operand.hbm [shape: bf16[2,32,128], index: 2, kind: input, shape index: {}]   ;;  %s3485_s3 = inlined_call_operand.hbm [shape: f32[2,1,128], index: 3, kind: input, shape index: {}]   ;;  %s3486_s4 = inlined_call_operand.hbm [shape: f32[2,16,32], index: 4, kind: input, shape index: {}]   ;;  %s3487_s5 = inlined_call_operand.hbm [shape: f32[2,16,32], index: 5, kind: input, shape index: {}]   ;;  %s3488_s6 = inlined_call_operand.hbm [shape: bf16[112,32], index: 6, kind: output, shape index: {}]  }
   0x1   :  { %12 = vsyncpa [#allocation8], 0 }
   0x2   :  { %13 = vsyncpa [#allocation11], 0 }
   0x3   :  { %14 = vsyncpa [#allocation14], 0 }
   0x4   :  { %15 = vsyncpa [#allocation6], 0  ;;  %s2827_s21 = smov [#allocation7]   ;;  %s2828_s23 = smov [#allocation10]  }
   0x5   :  { %s33_s22 = sshll.u32 %s2827_s21, 4  ;;  %s57_s24 = sshll.u32 %s2828_s23, 4  ;;  %s34_s22 = int_to_ptr.vmem [resolvable:$true] %s33_s22  ;;  %s2878_s24 = int_to_ptr.vmem [resolvable:$true] %s57_s24 }
   0x6   :  { %s2663_s27 = scalar_lea.hbm %s3483_s1, 512 }
   0x7   :  { %p2664_p0 = scmp.ne.s32.totalorder %s3483_s1, %s2663_s27  ;;  %p2667_p1 = scmp.lt.u32.totalorder %s2663_s27, %s3483_s1 }
   0x9   :  { %p2669_p2 = pnand %p2667_p1, %p2664_p0 }
   0xb   :  { %2672 = shalt.err (!%p2669_p2)
}
   0xc   :  { %s2673_s8 = scalar_lea.vmem %s34_s22, 512  ;;  %p2678_p4 = scmp.lt.s32.totalorder %s34_s22, %s34_s22 }
   0xd   :  { %p2674_p3 = scmp.ne.s32.totalorder %s34_s22, %s2673_s8  ;;  %p2679_p5 = scmp.lt.s32.totalorder %s2673_s8, %s2673_s8 }
   0xf   :  { %p2680_p6 = por %p2679_p5, %p2678_p4 }
  0x11   :  { %p2681_p7 = pnand %p2680_p6, %p2674_p3 }
  0x13   :  { %2684 = shalt.err (!%p2681_p7)
}
  0x14   :  { %s2829_s9 = smov 64   ;;  %s2830_s10 = smov 4  }
  0x15   :  { %39 = dma.hbm_to_vmem [thread:$0]  %s3483_s1, 512, %s34_s22, [#allocation8], %s2829_s9, %s2829_s9, %s2830_s10  }
  0x16   :  { %s2685_s15 = scalar_lea.hbm %s3485_s3, 32 }
  0x17   :  { %p2686_p8 = scmp.ne.s32.totalorder %s3485_s3, %s2685_s15  ;;  %p2689_p9 = scmp.lt.u32.totalorder %s2685_s15, %s3485_s3 }
  0x19   :  { %p2691_p10 = pnand %p2689_p9, %p2686_p8 }
  0x1b   :  { %2694 = shalt.err (!%p2691_p10)
}
  0x1c   :  { %s2695_s20 = scalar_lea.vmem %s2878_s24, 32  ;;  %p2700_p12 = scmp.lt.s32.totalorder %s2878_s24, %s2878_s24 }
  0x1d   :  { %p2696_p11 = scmp.ne.s32.totalorder %s2878_s24, %s2695_s20  ;;  %p2701_p13 = scmp.lt.s32.totalorder %s2695_s20, %s2695_s20 }
  0x1f   :  { %p2702_p0 = por %p2701_p13, %p2700_p12 }
  0x21   :  { %p2703_p1 = pnand %p2702_p0, %p2696_p11 }
  0x23   :  { %2706 = shalt.err (!%p2703_p1)
}
  0x24   :  { %s2831_s1 = smov 16   ;;  %s2832_s21 = smov 1  }
  0x25   :  { %63 = dma.hbm_to_vmem [thread:$0]  %s3485_s3, 32, %s2878_s24, [#allocation11], %s2831_s1, %s2831_s1, %s2832_s21  }
  0x26   :  { %s2833_s25 = smov [#allocation4]   ;;  %s2834_s27 = smov [#allocation9]  }
  0x27   :  { %s21_s26 = sshll.u32 %s2833_s25, 4  ;;  %s45_s28 = sshll.u32 %s2834_s27, 4  ;;  %s22_s26 = int_to_ptr.vmem [resolvable:$true] %s21_s26  ;;  %s2912_s28 = int_to_ptr.vmem [resolvable:$true] %s45_s28 }
  0x28   :  { %s2707_s7 = scalar_lea.hbm %s3482_s0, 896 }
  0x29   :  { %p2708_p2 = scmp.ne.s32.totalorder %s3482_s0, %s2707_s7  ;;  %p2711_p3 = scmp.lt.u32.totalorder %s2707_s7, %s3482_s0 }
  0x2b   :  { %p2713_p4 = pnand %p2711_p3, %p2708_p2 }
  0x2d   :  { %2716 = shalt.err (!%p2713_p4)
}
  0x2e   :  { %s2717_s3 = scalar_lea.vmem %s22_s26, 896  ;;  %p2722_p6 = scmp.lt.s32.totalorder %s22_s26, %s22_s26 }
  0x2f   :  { %p2718_p5 = scmp.ne.s32.totalorder %s22_s26, %s2717_s3  ;;  %p2723_p7 = scmp.lt.s32.totalorder %s2717_s3, %s2717_s3 }
  0x31   :  { %p2724_p8 = por %p2723_p7, %p2722_p6 }
  0x33   :  { %p2725_p9 = pnand %p2724_p8, %p2718_p5 }
  0x35   :  { %2728 = shalt.err (!%p2725_p9)
}
  0x36   :  { %27 = dma.hbm_to_vmem [thread:$0]  %s3482_s0, 896, %s22_s26, [#allocation5], %s2829_s9, %s2829_s9, %s2830_s10  }
  0x37   :  { %s2729_s17 = scalar_lea.hbm %s3484_s2, 512 }
  0x38   :  { %p2730_p10 = scmp.ne.s32.totalorder %s3484_s2, %s2729_s17  ;;  %p2733_p11 = scmp.lt.u32.totalorder %s2729_s17, %s3484_s2 }
  0x3a   :  { %p2735_p12 = pnand %p2733_p11, %p2730_p10 }
  0x3c   :  { %2738 = shalt.err (!%p2735_p12)
}
  0x3d   :  { %s2739_s21 = scalar_lea.vmem %s2912_s28, 512  ;;  %p2744_p0 = scmp.lt.s32.totalorder %s2912_s28, %s2912_s28 }
  0x3e   :  { %p2740_p13 = scmp.ne.s32.totalorder %s2912_s28, %s2739_s21  ;;  %p2745_p1 = scmp.lt.s32.totalorder %s2739_s21, %s2739_s21 }
  0x40   :  { %p2746_p2 = por %p2745_p1, %p2744_p0 }
  0x42   :  { %p2747_p3 = pnand %p2746_p2, %p2740_p13 }
  0x44   :  { %2750 = shalt.err (!%p2747_p3)
}
  0x45   :  { %51 = dma.hbm_to_vmem [thread:$0]  %s3484_s2, 512, %s2912_s28, [#allocation8], %s2829_s9, %s2829_s9, %s2830_s10  }
  0x46   :  { %s2835_s23 = smov [#allocation12]   ;;  %s2751_s29 = scalar_lea.hbm %s3486_s4, 512 }
  0x47   :  { %s69_s25 = sshll.u32 %s2835_s23, 4  ;;  %p2752_p4 = scmp.ne.s32.totalorder %s3486_s4, %s2751_s29  ;;  %s70_s25 = int_to_ptr.vmem [resolvable:$true] %s69_s25 }
  0x48   :  { %p2755_p5 = scmp.lt.u32.totalorder %s2751_s29, %s3486_s4 }
  0x4a   :  { %p2757_p6 = pnand %p2755_p5, %p2752_p4 }
  0x4c   :  { %2760 = shalt.err (!%p2757_p6)
}
  0x4d   :  { %s2761_s12 = scalar_lea.vmem %s70_s25, 512  ;;  %p2766_p8 = scmp.lt.s32.totalorder %s70_s25, %s70_s25 }
  0x4e   :  { %p2762_p7 = scmp.ne.s32.totalorder %s70_s25, %s2761_s12  ;;  %p2767_p9 = scmp.lt.s32.totalorder %s2761_s12, %s2761_s12 }
  0x50   :  { %p2768_p10 = por %p2767_p9, %p2766_p8 }
  0x52   :  { %p2769_p11 = pnand %p2768_p10, %p2762_p7 }
  0x54   :  { %2772 = shalt.err (!%p2769_p11)
}
  0x55   :  { %s2836_s2 = smov 128   ;;  %s2837_s28 = smov 8  }
  0x56   :  { %75 = dma.hbm_to_vmem [thread:$0]  %s3486_s4, 512, %s70_s25, [#allocation11], %s2836_s2, %s2836_s2, %s2837_s28  }
  0x57   :  { %s2838_s24 = smov [#allocation13]   ;;  %s2773_s17 = scalar_lea.hbm %s3487_s5, 512 }
  0x58   :  { %s81_s14 = sshll.u32 %s2838_s24, 4  ;;  %p2774_p12 = scmp.ne.s32.totalorder %s3487_s5, %s2773_s17  ;;  %s82_s14 = int_to_ptr.vmem [resolvable:$true] %s81_s14 }
  0x59   :  { %p2777_p13 = scmp.lt.u32.totalorder %s2773_s17, %s3487_s5 }
  0x5b   :  { %p2779_p0 = pnand %p2777_p13, %p2774_p12 }
  0x5d   :  { %2782 = shalt.err (!%p2779_p0)
}
  0x5e   :  { %s2783_s21 = scalar_lea.vmem %s82_s14, 512  ;;  %p2788_p2 = scmp.lt.s32.totalorder %s82_s14, %s82_s14 }
  0x5f   :  { %p2784_p1 = scmp.ne.s32.totalorder %s82_s14, %s2783_s21  ;;  %p2789_p3 = scmp.lt.s32.totalorder %s2783_s21, %s2783_s21 }
  0x61   :  { %p2790_p4 = por %p2789_p3, %p2788_p2 }
  0x63   :  { %p2791_p5 = pnand %p2790_p4, %p2784_p1 }
  0x65   :  { %2794 = shalt.err (!%p2791_p5)
}
  0x66   :  { %87 = dma.hbm_to_vmem [thread:$0]  %s3487_s5, 512, %s82_s14, [#allocation14], %s2836_s2, %s2836_s2, %s2837_s28  }
  0x67   :  { %2817 = dma.done.wait [#allocation5], 896  }
  0x68   :  { %2818 = vsyncadd [#allocation5], 4294966400 }
  0x69   :  { %2819 = dma.done.wait [#allocation8], 1024  }
  0x6a   :  { %2820 = vsyncadd [#allocation8], 4294966272 }
  0x6b   :  { %2821 = dma.done.wait [#allocation11], 544  }
  0x6c   :  { %2822 = vsyncadd [#allocation11], 4294966752 }
  0x6d   :  { %2823 = dma.done.wait [#allocation14], 512  }
  0x6e   :  { %2824 = vsyncadd [#allocation14], 4294966784  ;;  %v2839_v0 = vmov 0.0   ;;  %vm2840_vm0 = vmmov 0   ;;  %v2423_v1 = vld [vmem:[#allocation7] sm:$0xff]   ;;  %v2424_v2 = vld [vmem:[#allocation7 + $0x8] sm:$0xff]  }
  0x6f   :  { %2231 = vmatprep.subr.bf16.mxu0 %v2839_v0  ;;  %2263 = vmatprep.subr.bf16.mxu1 %v2839_v0  ;;  %v2979_v3 = vld [vmem:[#allocation9] sm:$0xff]   ;;  %v2426_v4 = vld [vmem:[#allocation4] sm:$0xff]   ;;  %vm179_vm1 = vcmask 261120   ;;  %s2841_s5 = smov 32   ;;  %v2428_v49 = vld [vmem:[#allocation4 + $0x8] sm:$0xff]   ;;  %vm1363_vm2 = vcmask 257024  }
  0x70   :  { %2235 = vmatprep.mubr.msk.bf16.mxu0 %vm2840_vm0, %v2839_v0  ;;  %2267 = vmatprep.mubr.msk.bf16.mxu1 %vm2840_vm0, %v2839_v0  ;;  %v2983_v5 = vld [vmem:[#allocation9 + $0x8] sm:$0xff]   ;;  %v3001_v11 = vld [vmem:[#allocation10] ss:$0 sm:$0xff]  ;;  %v2429_v51 = vld [vmem:[#allocation4 + $0x10] sm:$0xff]   ;;  %s2842_s22 = smov [#allocation15]  }
  0x71   :  { %2232 = vmatpush3.bf16.msra.mxu0 %v2423_v1  ;;  %2264 = vmatpush3.bf16.msra.mxu1 %v2979_v3  ;;  %v308_v6 = vld [vmem:[#allocation12] sm:$0xff]  ;;  %v309_v7 = vld [vmem:[#allocation12 + $0x8] sm:$0xff]  ;;  %v2433_v56 = vld [vmem:[#allocation4 + $0x30] sm:$0xff]   ;;  %s2055_s23 = sshll.u32 %s2842_s22, 4  ;;  %s2056_s23 = int_to_ptr.vmem [resolvable:$true] %s2055_s23 }
  0x72   :  { %2233 = vmatprep.subr.bf16.mxu0 %v2839_v0  ;;  %2265 = vmatprep.subr.bf16.mxu1 %v2839_v0  ;;  %v311_v8 = vld [vmem:[#allocation13] sm:$0xff]  ;;  %v312_v9 = vld [vmem:[#allocation13 + $0x8] sm:$0xff]  ;;  %v310_v10 = vpack.c.bf16 %v309_v7, %v308_v6  ;;  %v2435_v58 = vld [vmem:[#allocation7 + $0x18] sm:$0xff]   ;;  %s2795_s25 = scalar_lea.vmem %s2056_s23, 896  ;;  %p2800_p7 = scmp.lt.s32.totalorder %s2056_s23, %s2056_s23 }
  0x73   :  { %390 = vrot.lane.b32.xlu1 %v311_v8, %s2841_s5  ;;  %v2430_v53 = vld [vmem:[#allocation4 + $0x18] sm:$0xff]   ;;  %v2431_v54 = vld [vmem:[#allocation4 + $0x20] sm:$0xff]   ;;  %v2432_v55 = vld [vmem:[#allocation4 + $0x28] sm:$0xff]   ;;  %p2796_p6 = scmp.ne.s32.totalorder %s2056_s23, %s2795_s25  ;;  %p2801_p8 = scmp.lt.s32.totalorder %s2795_s25, %s2795_s25 }
  0x74   :  { %v2434_v57 = vld [vmem:[#allocation7 + $0x10] sm:$0xff]  }
  0x75   :  { %2234 = vmatpush3.bf16.msra.mxu0 %v2424_v2  ;;  %2266 = vmatpush3.bf16.msra.mxu1 %v2983_v5  ;;  %p2802_p9 = por %p2801_p8, %p2800_p7 }
  0x76   :  { %2319 = vmatprep.subr.bf16.mxu0 %v2839_v0  ;;  %2271 = vmatprep.subr.bf16.mxu1 %v2839_v0 }
  0x77   :  { %392 = vrot.lane.b32.xlu1 %v312_v9, %s2841_s5  ;;  %p2803_p10 = pnand %p2802_p9, %p2796_p6 }
  0x78   :  { %2236 = vmatmul.mubr.msk.bf16.vlgmr.msra.gmra.mrb[0].mxu0 %vm179_vm1, %v2426_v4  ;;  %2268 = vmatmul.mubr.msk.bf16.vlgmr.msra.gmra.mrb[0].mxu1 %vm179_vm1, %v310_v10 }
  0x79   :  { %2239 = vmatprep.mubr.msk.bf16.mxu0 %vm2840_vm0, %v2839_v0  ;;  %2272 = vmatpush3.bf16.msra.mxu1 %v2979_v3 }
  0x7a   :  { %2275 = vmatprep.mubr.msk.bf16.mxu1 %vm2840_vm0, %v2839_v0  ;;  %2273 = vmatprep.subr.bf16.mxu1 %v2839_v0 }
  0x7b   :  { %2320 = vmatpush3.bf16.msra.mxu0 %v2434_v57 }
  0x7c   :  { %2321 = vmatprep.subr.bf16.mxu0 %v2839_v0 }
  0x7d   :  { %2274 = vmatpush3.bf16.msra.mxu1 %v2983_v5 }
  0x7e   :  { %2279 = vmatprep.subr.bf16.mxu1 %v2839_v0 }
  0x7f   :  { %2322 = vmatpush3.bf16.msra.mxu0 %v2435_v58  ;;  %v3070_v58 = vld [vmem:[#allocation10 + $0x1] ss:$0 sm:$0xff] }
  0x80   :  { %2240 = vmatmul.mubr.msk.bf16.gmra.mrb[4].mxu0 %vm179_vm1, %v2428_v49 }
  0x81   :  { %2243 = vmatprep.mubr.msk.bf16.mxu0 %vm2840_vm0, %v2839_v0 }
  0x88   :  { %2244 = vmatmul.mubr.msk.bf16.gmra.mrb[8].mxu0 %vm179_vm1, %v2429_v51 }
  0x89   :  { %2247 = vmatprep.mubr.msk.bf16.mxu0 %vm2840_vm0, %v2839_v0 }
  0x90   :  { %2248 = vmatmul.mubr.msk.bf16.gmra.mrb[12].mxu0 %vm179_vm1, %v2430_v53 }
  0x91   :  { %2251 = vmatprep.mubr.msk.bf16.mxu0 %vm2840_vm0, %v2839_v0 }
  0x98   :  { %2252 = vmatmul.mubr.msk.bf16.gmra.mrb[16].mxu0 %vm179_vm1, %v2431_v54 }
  0x99   :  { %2255 = vmatprep.mubr.msk.bf16.mxu0 %vm2840_vm0, %v2839_v0 }
  0xa0   :  { %2256 = vmatmul.mubr.msk.bf16.gmra.mrb[20].mxu0 %vm179_vm1, %v2432_v55 }
  0xa1   :  { %2259 = vmatprep.mubr.msk.bf16.mxu0 %vm2840_vm0, %v2839_v0 }
  0xa8   :  { %2260 = vmatmul.mubr.msk.bf16.gmra.mrb[24].mxu0 %vm179_vm1, %v2433_v56 }
  0xa9   :  { %2323 = vmatprep.mubr.msk.bf16.mxu0 %vm2840_vm0, %v2839_v0 }
  0xe5   :  { %v391_v41 = vpop.permute.xlu1 %390 }
  0xe9   :  { %v393_v43 = vpop.permute.xlu1 %392 }
 0x14b   :  { %v235_v12 = vpop.f32.mrb[0].mxu0  ;;  %v363_v15 = vpop.f32.mrb[0].mxu1 }
 0x14c   :  { %v2237_v13 = vpop.f32.mrb[1].mxu0  ;;  %v236_v16 = vadd.f32 %v3001_v11, %v235_v12  ;;  %v2269_v19 = vpop.f32.mrb[1].mxu1 }
 0x14d   :  { %v238_v14 = vpop.f32.mrb[2].mxu0  ;;  %v366_v20 = vpop.f32.mrb[2].mxu1 }
 0x14e   :  { %v239_v17 = vadd.f32 %v3001_v11, %v238_v14  ;;  %v2238_v18 = vpop.f32.mrb[3].mxu0  ;;  %v2270_v22 = vpop.f32.mrb[3].mxu1 }
 0x150   :  { %v290_v21 = vpack.c.bf16 %v239_v17, %v236_v16 }
 0x152   :  { %v370_v23 = vunpack.c.l.bf16 %v290_v21  ;;  %v371_v24 = vunpack.c.h.bf16 %v290_v21 }
 0x153   :  { %v243_v1 = vpop.f32.mrb[4].mxu0 }
 0x154   :  { %v372_v25 = vadd.f32 %v370_v23, %v363_v15  ;;  %v373_v26 = vadd.f32 %v371_v24, %v366_v20  ;;  %v244_v2 = vadd.f32 %v3001_v11, %v243_v1  ;;  %v2241_v4 = vpop.f32.mrb[5].mxu0 }
 0x155   :  { %v246_v6 = vpop.f32.mrb[6].mxu0 }
 0x156   :  { %2438 = vtanh.f32 %v372_v25  ;;  %v2090_v29 = vmul.f32 -1.442695, %v372_v25  ;;  %v2091_v30 = vmul.f32 -1.442695, %v373_v26  ;;  %v247_v7 = vadd.f32 %v3001_v11, %v246_v6  ;;  %v2242_v8 = vpop.f32.mrb[7].mxu0 }
 0x157   :  { %2440 = vtanh.f32 %v373_v26 }
 0x158   :  { %2442 = vpow2.f32 %v2090_v29  ;;  %v291_v9 = vpack.c.bf16 %v247_v7, %v244_v2 }
 0x159   :  { %2444 = vpow2.f32 %v2091_v30 }
 0x15a   :  { %v483_v54 = vunpack.c.h.bf16 %v291_v9 }
 0x15b   :  { %v251_v10 = vpop.f32.mrb[8].mxu0 }
 0x15c   :  { %v252_v12 = vadd.f32 %v3001_v11, %v251_v10  ;;  %v2245_v13 = vpop.f32.mrb[9].mxu0 }
 0x15d   :  { %v254_v14 = vpop.f32.mrb[10].mxu0 }
 0x15e   :  { %v255_v15 = vadd.f32 %v3001_v11, %v254_v14  ;;  %v2246_v16 = vpop.f32.mrb[11].mxu0 }
 0x160   :  { %v2439_v27 = vpop.eup %2438  ;;  %v3041_v17 = vpack.c.bf16 %v255_v15, %v252_v12 }
 0x161   :  { %400 = vrot.lane.b32.xlu0 %v2439_v27, %s2829_s9  ;;  %v2441_v28 = vpop.eup %2440 }
 0x162   :  { %v2443_v31 = vpop.eup %2442 }
 0x163   :  { %v380_v32 = vadd.f32 1.0, %v2443_v31  ;;  %v2445_v33 = vpop.eup %2444  ;;  %v259_v18 = vpop.f32.mrb[12].mxu0 }
 0x164   :  { %v381_v34 = vadd.f32 1.0, %v2445_v33  ;;  %v260_v19 = vadd.f32 %v3001_v11, %v259_v18  ;;  %v2249_v20 = vpop.f32.mrb[13].mxu0 }
 0x165   :  { %402 = vrot.lane.b32.xlu0 %v2441_v28, %s2829_s9  ;;  %2446 = vrcp.f32 %v380_v32  ;;  %v262_v21 = vpop.f32.mrb[14].mxu0 }
 0x166   :  { %2448 = vrcp.f32 %v381_v34  ;;  %v263_v22 = vadd.f32 %v3001_v11, %v262_v21  ;;  %v2250_v23 = vpop.f32.mrb[15].mxu0 }
 0x168   :  { %v3045_v24 = vpack.c.bf16 %v263_v22, %v260_v19 }
 0x16b   :  { %v267_v25 = vpop.f32.mrb[16].mxu0 }
 0x16c   :  { %v268_v26 = vadd.f32 %v3001_v11, %v267_v25  ;;  %v2253_v27 = vpop.f32.mrb[17].mxu0 }
 0x16d   :  { %v270_v28 = vpop.f32.mrb[18].mxu0 }
 0x16e   :  { %v271_v29 = vadd.f32 %v3001_v11, %v270_v28  ;;  %v2254_v30 = vpop.f32.mrb[19].mxu0 }
 0x16f   :  { %v2447_v35 = vpop.eup %2446 }
 0x170   :  { %v2449_v38 = vpop.eup %2448  ;;  %v396_v42 = vmul.f32 %v2447_v35, %v391_v41  ;;  %v3049_v32 = vpack.c.bf16 %v271_v29, %v268_v26 }
 0x171   :  { %v397_v46 = vmul.f32 %v2449_v38, %v393_v43 }
 0x173   :  { %v275_v33 = vpop.f32.mrb[20].mxu0 }
 0x174   :  { %v2257_v34 = vpop.f32.mrb[21].mxu0 }
 0x1d3   :  { %v401_v36 = vpop.permute.xlu0 %400 }
 0x1d4   :  { %v406_v37 = vmul.f32 %v2447_v35, %v401_v36  ;;  %v278_v36 = vpop.f32.mrb[22].mxu0 }
 0x1d5   :  { %v279_v43 = vadd.f32 %v3001_v11, %v278_v36 }
 0x1d6   :  { %410 = vrot.lane.b32.xlu0 %v406_v37, %s2841_s5  ;;  %v2258_v37 = vpop.f32.mrb[23].mxu0 }
 0x1d7   :  { %v403_v39 = vpop.permute.xlu0 %402 }
 0x1d8   :  { %v407_v40 = vmul.f32 %v2449_v38, %v403_v39 }
 0x1da   :  { %412 = vrot.lane.b32.xlu1 %v407_v40, %s2841_s5 }
 0x248   :  { %v411_v44 = vpop.permute.xlu0 %410 }
 0x249   :  { %v3009_v45 = vadd.f32 %v411_v44, %v396_v42  ;;  %v276_v42 = vadd.f32 %v3001_v11, %v275_v33 }
 0x24b   :  { %2450 = vtanh.f32 %v3009_v45  ;;  %v3064_v44 = vpack.c.bf16 %v279_v43, %v276_v42 }
 0x24c   :  { %v413_v47 = vpop.permute.xlu1 %412 }
 0x24d   :  { %v3012_v48 = vadd.f32 %v413_v47, %v397_v46 }
 0x24f   :  { %2452 = vtanh.f32 %v3012_v48 }
 0x255   :  { %v2451_v50 = vpop.eup %2450 }
 0x256   :  { %422 = vrot.lane.b32.xlu0 %v2451_v50, %s2829_s9  ;;  %v482_v50 = vunpack.c.l.bf16 %v291_v9 }
 0x259   :  { %v2453_v52 = vpop.eup %2452 }
 0x25a   :  { %424 = vrot.lane.b32.xlu1 %v2453_v52, %s2829_s9 }
 0x2c8   :  { %v423_v59 = vpop.permute.xlu0 %422 }
 0x2c9   :  { %v428_v61 = vmul.f32 %v2447_v35, %v423_v59 }
 0x2cc   :  { %v425_v60 = vpop.permute.xlu1 %424 }
 0x2cd   :  { %v429_v62 = vmul.f32 %v2449_v38, %v425_v60  ;;  %v283_v38 = vpop.f32.mrb[24].mxu0 }
 0x2ce   :  { %v2261_v39 = vpop.f32.mrb[25].mxu0  ;;  %v284_v46 = vadd.f32 %v3001_v11, %v283_v38 }
 0x2cf   :  { %v430_v63 = vpack.c.bf16 %v429_v62, %v428_v61  ;;  %v286_v40 = vpop.f32.mrb[26].mxu0  ;;  %v588_v39 = vunpack.c.h.bf16 %v3041_v17 }
 0x2d0   :  { %v2262_v41 = vpop.f32.mrb[27].mxu0  ;;  %v287_v47 = vadd.f32 %v3001_v11, %v286_v40 }
 0x2d1   :  { %432 = vrot.lane.b32.xlu0 %v430_v63, %s2841_s5 }
 0x2d2   :  { %v3068_v49 = vpack.c.bf16 %v287_v47, %v284_v46 }
 0x343   :  { %v433_v31 = vpop.permute.xlu0 %432 }
 0x344   :  { %435 = vst.msk [vmem:[#allocation2] sm:$0xff] %vm179_vm1, %v433_v31  ;;  %2276 = vmatmul.mubr.msk.bf16.vlgmr.msra.gmra.mrb[4].mxu1 %vm179_vm1, %v433_v31 }
 0x345   :  { %2280 = vmatpush3.bf16.msra.mxu1 %v2979_v3  ;;  %2283 = vmatprep.mubr.msk.bf16.mxu1 %vm2840_vm0, %v2839_v0 }
 0x346   :  { %2281 = vmatprep.subr.bf16.mxu1 %v2839_v0 }
 0x349   :  { %2282 = vmatpush3.bf16.msra.mxu1 %v2983_v5 }
 0x34a   :  { %2287 = vmatprep.subr.bf16.mxu1 %v2839_v0 }
 0x34b   :  { %v1066_v35 = vld [vmem:[#allocation2] sm:$0xff] }
 0x34c   :  { %2324 = vmatmul.mubr.msk.bf16.vlgmr.msra.gmra.mrb[28].mxu0 %vm179_vm1, %v1066_v35  ;;  %v587_v35 = vunpack.c.l.bf16 %v3041_v17 }
 0x34d   :  { %2327 = vmatprep.mubr.msk.bf16.mxu0 %vm2840_vm0, %v2839_v0 }
 0x417   :  { %v475_v51 = vpop.f32.mrb[4].mxu1 }
 0x418   :  { %v484_v52 = vadd.f32 %v482_v50, %v475_v51  ;;  %v2277_v53 = vpop.f32.mrb[5].mxu1 }
 0x419   :  { %v478_v55 = vpop.f32.mrb[6].mxu1 }
 0x41a   :  { %2454 = vtanh.f32 %v484_v52  ;;  %v485_v56 = vadd.f32 %v483_v54, %v478_v55  ;;  %v2278_v57 = vpop.f32.mrb[7].mxu1  ;;  %v2093_v6 = vmul.f32 -1.442695, %v484_v52 }
 0x41c   :  { %2456 = vtanh.f32 %v485_v56  ;;  %v2094_v7 = vmul.f32 -1.442695, %v485_v56 }
 0x41d   :  { %2458 = vpow2.f32 %v2093_v6 }
 0x41e   :  { %2460 = vpow2.f32 %v2094_v7 }
 0x41f   :  { %v1153_v59 = vpop.f32.mrb[28].mxu0 }
 0x420   :  { %v2325_v60 = vpop.f32.mrb[29].mxu0  ;;  %v1154_v62 = vadd.f32 %v3070_v58, %v1153_v59 }
 0x421   :  { %v1156_v61 = vpop.f32.mrb[30].mxu0 }
 0x422   :  { %v1157_v11 = vadd.f32 %v3070_v58, %v1156_v61  ;;  %v2326_v63 = vpop.f32.mrb[31].mxu0 }
 0x424   :  { %v2455_v1 = vpop.eup %2454  ;;  %v3074_v2 = vpack.c.bf16 %v1157_v11, %v1154_v62 }
 0x425   :  { %504 = vrot.lane.b32.xlu1 %v2455_v1, %s2829_s9 }
 0x426   :  { %v2457_v4 = vpop.eup %2456 }
 0x427   :  { %506 = vrot.lane.b32.xlu0 %v2457_v4, %s2829_s9  ;;  %v2459_v8 = vpop.eup %2458 }
 0x428   :  { %v2461_v9 = vpop.eup %2460  ;;  %v492_v10 = vadd.f32 1.0, %v2459_v8 }
 0x429   :  { %v493_v12 = vadd.f32 1.0, %v2461_v9 }
 0x42a   :  { %2462 = vrcp.f32 %v492_v10 }
 0x42b   :  { %2464 = vrcp.f32 %v493_v12 }
 0x434   :  { %v2463_v13 = vpop.eup %2462 }
 0x435   :  { %v2465_v16 = vpop.eup %2464  ;;  %v500_v20 = vmul.f32 %v2463_v13, %v3009_v45 }
 0x436   :  { %v501_v23 = vmul.f32 %v2465_v16, %v3012_v48 }
 0x497   :  { %v505_v14 = vpop.permute.xlu1 %504 }
 0x498   :  { %v510_v15 = vmul.f32 %v2463_v13, %v505_v14 }
 0x499   :  { %v507_v18 = vpop.permute.xlu0 %506 }
 0x49a   :  { %514 = vrot.lane.b32.xlu1 %v510_v15, %s2841_s5  ;;  %v511_v19 = vmul.f32 %v2465_v16, %v507_v18 }
 0x49c   :  { %516 = vrot.lane.b32.xlu0 %v511_v19, %s2841_s5 }
 0x50c   :  { %v515_v21 = vpop.permute.xlu1 %514 }
 0x50d   :  { %v3081_v22 = vadd.f32 %v515_v21, %v500_v20 }
 0x50e   :  { %v517_v25 = vpop.permute.xlu0 %516 }
 0x50f   :  { %2466 = vtanh.f32 %v3081_v22  ;;  %v3085_v26 = vadd.f32 %v517_v25, %v501_v23  ;;  %v692_v25 = vunpack.c.l.bf16 %v3045_v24 }
 0x511   :  { %2468 = vtanh.f32 %v3085_v26 }
 0x519   :  { %v2467_v27 = vpop.eup %2466 }
 0x51a   :  { %526 = vrot.lane.b32.xlu1 %v2467_v27, %s2829_s9 }
 0x51b   :  { %v2469_v28 = vpop.eup %2468 }
 0x51c   :  { %528 = vrot.lane.b32.xlu0 %v2469_v28, %s2829_s9 }
 0x58c   :  { %v527_v29 = vpop.permute.xlu1 %526 }
 0x58d   :  { %v532_v30 = vmul.f32 %v2463_v13, %v527_v29  ;;  %v693_v29 = vunpack.c.h.bf16 %v3045_v24 }
 0x58e   :  { %v529_v45 = vpop.permute.xlu0 %528 }
 0x58f   :  { %v533_v31 = vmul.f32 %v2465_v16, %v529_v45 }
 0x591   :  { %v534_v33 = vpack.c.bf16 %v533_v31, %v532_v30 }
 0x593   :  { %536 = vrot.lane.b32.xlu1 %v534_v33, %s2841_s5 }
 0x605   :  { %v537_v48 = vpop.permute.xlu1 %536 }
 0x606   :  { %540 = vst.msk [vmem:[#allocation2 + $0x8] sm:$0xff] %vm179_vm1, %v537_v48  ;;  %2284 = vmatmul.mubr.msk.bf16.vlgmr.msra.gmra.mrb[8].mxu1 %vm179_vm1, %v537_v48 }
 0x607   :  { %2288 = vmatpush3.bf16.msra.mxu1 %v2979_v3  ;;  %2291 = vmatprep.mubr.msk.bf16.mxu1 %vm2840_vm0, %v2839_v0 }
 0x608   :  { %2289 = vmatprep.subr.bf16.mxu1 %v2839_v0 }
 0x60b   :  { %2290 = vmatpush3.bf16.msra.mxu1 %v2983_v5 }
 0x60c   :  { %2295 = vmatprep.subr.bf16.mxu1 %v2839_v0 }
 0x60d   :  { %v1067_v34 = vld [vmem:[#allocation2 + $0x8] sm:$0xff] }
 0x60e   :  { %2328 = vmatmul.mubr.msk.bf16.gmra.mrb[32].mxu0 %vm179_vm1, %v1067_v34 }
 0x60f   :  { %2331 = vmatprep.mubr.msk.bf16.mxu0 %vm2840_vm0, %v2839_v0 }
 0x6d9   :  { %v580_v36 = vpop.f32.mrb[8].mxu1 }
 0x6da   :  { %v589_v37 = vadd.f32 %v587_v35, %v580_v36  ;;  %v2285_v38 = vpop.f32.mrb[9].mxu1 }
 0x6db   :  { %v583_v40 = vpop.f32.mrb[10].mxu1 }
 0x6dc   :  { %2470 = vtanh.f32 %v589_v37  ;;  %v590_v41 = vadd.f32 %v588_v39, %v583_v40  ;;  %v2286_v42 = vpop.f32.mrb[11].mxu1  ;;  %v2096_v17 = vmul.f32 -1.442695, %v589_v37 }
 0x6de   :  { %2472 = vtanh.f32 %v590_v41  ;;  %v2097_v56 = vmul.f32 -1.442695, %v590_v41 }
 0x6df   :  { %2474 = vpow2.f32 %v2096_v17 }
 0x6e0   :  { %2476 = vpow2.f32 %v2097_v56 }
 0x6e1   :  { %v1161_v43 = vpop.f32.mrb[32].mxu0 }
 0x6e2   :  { %v2329_v46 = vpop.f32.mrb[33].mxu0  ;;  %v1162_v50 = vadd.f32 %v3070_v58, %v1161_v43 }
 0x6e3   :  { %v1164_v47 = vpop.f32.mrb[34].mxu0 }
 0x6e4   :  { %v1165_v51 = vadd.f32 %v3070_v58, %v1164_v47  ;;  %v2330_v52 = vpop.f32.mrb[35].mxu0 }
 0x6e6   :  { %v2471_v53 = vpop.eup %2470  ;;  %v3106_v54 = vpack.c.bf16 %v1165_v51, %v1162_v50 }
 0x6e7   :  { %609 = vrot.lane.b32.xlu0 %v2471_v53, %s2829_s9 }
 0x6e8   :  { %v2473_v55 = vpop.eup %2472 }
 0x6e9   :  { %611 = vrot.lane.b32.xlu1 %v2473_v55, %s2829_s9  ;;  %v2475_v57 = vpop.eup %2474 }
 0x6ea   :  { %v2477_v59 = vpop.eup %2476  ;;  %v597_v60 = vadd.f32 1.0, %v2475_v57 }
 0x6eb   :  { %v598_v61 = vadd.f32 1.0, %v2477_v59 }
 0x6ec   :  { %2478 = vrcp.f32 %v597_v60 }
 0x6ed   :  { %2480 = vrcp.f32 %v598_v61 }
 0x6f6   :  { %v2479_v62 = vpop.eup %2478 }
 0x6f7   :  { %v2481_v1 = vpop.eup %2480  ;;  %v605_v7 = vmul.f32 %v2479_v62, %v3081_v22 }
 0x6f8   :  { %v606_v10 = vmul.f32 %v2481_v1, %v3085_v26 }
 0x759   :  { %v610_v11 = vpop.permute.xlu0 %609 }
 0x75a   :  { %v615_v63 = vmul.f32 %v2479_v62, %v610_v11 }
 0x75b   :  { %v612_v4 = vpop.permute.xlu1 %611 }
 0x75c   :  { %619 = vrot.lane.b32.xlu0 %v615_v63, %s2841_s5  ;;  %v616_v6 = vmul.f32 %v2481_v1, %v612_v4 }
 0x75e   :  { %621 = vrot.lane.b32.xlu1 %v616_v6, %s2841_s5 }
 0x7ce   :  { %v620_v8 = vpop.permute.xlu0 %619 }
 0x7cf   :  { %v3113_v9 = vadd.f32 %v620_v8, %v605_v7 }
 0x7d0   :  { %v622_v12 = vpop.permute.xlu1 %621 }
 0x7d1   :  { %2482 = vtanh.f32 %v3113_v9  ;;  %v3117_v13 = vadd.f32 %v622_v12, %v606_v10  ;;  %v797_v12 = vunpack.c.l.bf16 %v3049_v32 }
 0x7d3   :  { %2484 = vtanh.f32 %v3117_v13 }
 0x7db   :  { %v2483_v14 = vpop.eup %2482 }
 0x7dc   :  { %631 = vrot.lane.b32.xlu0 %v2483_v14, %s2829_s9 }
 0x7dd   :  { %v2485_v15 = vpop.eup %2484 }
 0x7de   :  { %633 = vrot.lane.b32.xlu1 %v2485_v15, %s2829_s9 }
 0x84e   :  { %v632_v16 = vpop.permute.xlu0 %631 }
 0x84f   :  { %v637_v19 = vmul.f32 %v2479_v62, %v632_v16  ;;  %v798_v16 = vunpack.c.h.bf16 %v3049_v32 }
 0x850   :  { %v634_v18 = vpop.permute.xlu1 %633 }
 0x851   :  { %v638_v20 = vmul.f32 %v2481_v1, %v634_v18 }
 0x853   :  { %v639_v21 = vpack.c.bf16 %v638_v20, %v637_v19 }
 0x855   :  { %641 = vrot.lane.b32.xlu0 %v639_v21, %s2841_s5 }
 0x8c7   :  { %v642_v22 = vpop.permute.xlu0 %641 }
 0x8c8   :  { %645 = vst.msk [vmem:[#allocation2 + $0x10] sm:$0xff] %vm179_vm1, %v642_v22  ;;  %2292 = vmatmul.mubr.msk.bf16.vlgmr.msra.gmra.mrb[12].mxu1 %vm179_vm1, %v642_v22 }
 0x8c9   :  { %2296 = vmatpush3.bf16.msra.mxu1 %v2979_v3  ;;  %2299 = vmatprep.mubr.msk.bf16.mxu1 %vm2840_vm0, %v2839_v0 }
 0x8ca   :  { %2297 = vmatprep.subr.bf16.mxu1 %v2839_v0 }
 0x8cd   :  { %2298 = vmatpush3.bf16.msra.mxu1 %v2983_v5 }
 0x8ce   :  { %2303 = vmatprep.subr.bf16.mxu1 %v2839_v0 }
 0x8cf   :  { %v1068_v23 = vld [vmem:[#allocation2 + $0x10] sm:$0xff] }
 0x8d0   :  { %2332 = vmatmul.mubr.msk.bf16.gmra.mrb[36].mxu0 %vm179_vm1, %v1068_v23 }
 0x8d1   :  { %2335 = vmatprep.mubr.msk.bf16.mxu0 %vm2840_vm0, %v2839_v0 }
 0x99b   :  { %v685_v26 = vpop.f32.mrb[12].mxu1 }
 0x99c   :  { %v694_v27 = vadd.f32 %v692_v25, %v685_v26  ;;  %v2293_v28 = vpop.f32.mrb[13].mxu1 }
 0x99d   :  { %v688_v45 = vpop.f32.mrb[14].mxu1 }
 0x99e   :  { %2486 = vtanh.f32 %v694_v27  ;;  %v695_v30 = vadd.f32 %v693_v29, %v688_v45  ;;  %v2294_v31 = vpop.f32.mrb[15].mxu1  ;;  %v2099_v24 = vmul.f32 -1.442695, %v694_v27 }
 0x9a0   :  { %2488 = vtanh.f32 %v695_v30  ;;  %v2100_v41 = vmul.f32 -1.442695, %v695_v30 }
 0x9a1   :  { %2490 = vpow2.f32 %v2099_v24 }
 0x9a2   :  { %2492 = vpow2.f32 %v2100_v41 }
 0x9a3   :  { %v1169_v33 = vpop.f32.mrb[36].mxu0 }
 0x9a4   :  { %v2333_v48 = vpop.f32.mrb[37].mxu0  ;;  %v1170_v35 = vadd.f32 %v3070_v58, %v1169_v33 }
 0x9a5   :  { %v1172_v34 = vpop.f32.mrb[38].mxu0 }
 0x9a6   :  { %v1173_v36 = vadd.f32 %v3070_v58, %v1172_v34  ;;  %v2334_v37 = vpop.f32.mrb[39].mxu0 }
 0x9a8   :  { %v2487_v38 = vpop.eup %2486  ;;  %v3138_v39 = vpack.c.bf16 %v1173_v36, %v1170_v35 }
 0x9a9   :  { %714 = vrot.lane.b32.xlu1 %v2487_v38, %s2829_s9 }
 0x9aa   :  { %v2489_v40 = vpop.eup %2488 }
 0x9ab   :  { %716 = vrot.lane.b32.xlu0 %v2489_v40, %s2829_s9  ;;  %v2491_v42 = vpop.eup %2490 }
 0x9ac   :  { %v2493_v43 = vpop.eup %2492  ;;  %v702_v46 = vadd.f32 1.0, %v2491_v42 }
 0x9ad   :  { %v703_v47 = vadd.f32 1.0, %v2493_v43 }
 0x9ae   :  { %2494 = vrcp.f32 %v702_v46 }
 0x9af   :  { %2496 = vrcp.f32 %v703_v47 }
 0x9b8   :  { %v2495_v50 = vpop.eup %2494 }
 0x9b9   :  { %v2497_v53 = vpop.eup %2496  ;;  %v710_v56 = vmul.f32 %v2495_v50, %v3113_v9 }
 0x9ba   :  { %v711_v60 = vmul.f32 %v2497_v53, %v3117_v13 }
 0xa1b   :  { %v715_v51 = vpop.permute.xlu1 %714 }
 0xa1c   :  { %v720_v52 = vmul.f32 %v2495_v50, %v715_v51 }
 0xa1d   :  { %v717_v55 = vpop.permute.xlu0 %716 }
 0xa1e   :  { %724 = vrot.lane.b32.xlu1 %v720_v52, %s2841_s5  ;;  %v721_v17 = vmul.f32 %v2497_v53, %v717_v55 }
 0xa20   :  { %726 = vrot.lane.b32.xlu0 %v721_v17, %s2841_s5 }
 0xa90   :  { %v725_v57 = vpop.permute.xlu1 %724 }
 0xa91   :  { %v3145_v59 = vadd.f32 %v725_v57, %v710_v56 }
 0xa92   :  { %v727_v61 = vpop.permute.xlu0 %726 }
 0xa93   :  { %2498 = vtanh.f32 %v3145_v59  ;;  %v3149_v62 = vadd.f32 %v727_v61, %v711_v60  ;;  %v902_v61 = vunpack.c.l.bf16 %v3064_v44 }
 0xa95   :  { %2500 = vtanh.f32 %v3149_v62 }
 0xa9d   :  { %v2499_v11 = vpop.eup %2498 }
 0xa9e   :  { %736 = vrot.lane.b32.xlu1 %v2499_v11, %s2829_s9 }
 0xa9f   :  { %v2501_v63 = vpop.eup %2500 }
 0xaa0   :  { %738 = vrot.lane.b32.xlu0 %v2501_v63, %s2829_s9  ;;  %v903_v63 = vunpack.c.h.bf16 %v3064_v44 }
 0xb10   :  { %v737_v1 = vpop.permute.xlu1 %736 }
 0xb11   :  { %v742_v6 = vmul.f32 %v2495_v50, %v737_v1 }
 0xb12   :  { %v739_v4 = vpop.permute.xlu0 %738 }
 0xb13   :  { %v743_v7 = vmul.f32 %v2497_v53, %v739_v4 }
 0xb15   :  { %v744_v8 = vpack.c.bf16 %v743_v7, %v742_v6 }
 0xb17   :  { %746 = vrot.lane.b32.xlu1 %v744_v8, %s2841_s5 }
 0xb89   :  { %v747_v9 = vpop.permute.xlu1 %746 }
 0xb8a   :  { %750 = vst.msk [vmem:[#allocation2 + $0x18] sm:$0xff] %vm179_vm1, %v747_v9  ;;  %2300 = vmatmul.mubr.msk.bf16.vlgmr.msra.gmra.mrb[16].mxu1 %vm179_vm1, %v747_v9 }
 0xb8b   :  { %2304 = vmatpush3.bf16.msra.mxu1 %v2979_v3  ;;  %2307 = vmatprep.mubr.msk.bf16.mxu1 %vm2840_vm0, %v2839_v0 }
 0xb8c   :  { %2305 = vmatprep.subr.bf16.mxu1 %v2839_v0 }
 0xb8f   :  { %2306 = vmatpush3.bf16.msra.mxu1 %v2983_v5 }
 0xb90   :  { %2311 = vmatprep.subr.bf16.mxu1 %v2839_v0 }
 0xb91   :  { %v1069_v10 = vld [vmem:[#allocation2 + $0x18] sm:$0xff] }
 0xb92   :  { %2336 = vmatmul.mubr.msk.bf16.gmra.mrb[40].mxu0 %vm179_vm1, %v1069_v10 }
 0xb93   :  { %2339 = vmatprep.mubr.msk.bf16.mxu0 %vm2840_vm0, %v2839_v0 }
 0xc5d   :  { %v790_v13 = vpop.f32.mrb[16].mxu1 }
 0xc5e   :  { %v799_v14 = vadd.f32 %v797_v12, %v790_v13  ;;  %v2301_v15 = vpop.f32.mrb[17].mxu1 }
 0xc5f   :  { %v793_v18 = vpop.f32.mrb[18].mxu1 }
 0xc60   :  { %2502 = vtanh.f32 %v799_v14  ;;  %v800_v19 = vadd.f32 %v798_v16, %v793_v18  ;;  %v2302_v20 = vpop.f32.mrb[19].mxu1  ;;  %v2102_v32 = vmul.f32 -1.442695, %v799_v14 }
 0xc62   :  { %2504 = vtanh.f32 %v800_v19  ;;  %v2103_v30 = vmul.f32 -1.442695, %v800_v19 }
 0xc63   :  { %2506 = vpow2.f32 %v2102_v32 }
 0xc64   :  { %2508 = vpow2.f32 %v2103_v30 }
 0xc65   :  { %v1177_v21 = vpop.f32.mrb[40].mxu0 }
 0xc66   :  { %v2337_v22 = vpop.f32.mrb[41].mxu0  ;;  %v1178_v25 = vadd.f32 %v3070_v58, %v1177_v21 }
 0xc67   :  { %v1180_v23 = vpop.f32.mrb[42].mxu0 }
 0xc68   :  { %v1181_v26 = vadd.f32 %v3070_v58, %v1180_v23  ;;  %v2338_v27 = vpop.f32.mrb[43].mxu0 }
 0xc6a   :  { %v2503_v28 = vpop.eup %2502  ;;  %v3170_v29 = vpack.c.bf16 %v1181_v26, %v1178_v25 }
 0xc6b   :  { %819 = vrot.lane.b32.xlu0 %v2503_v28, %s2829_s9 }
 0xc6c   :  { %v2505_v45 = vpop.eup %2504 }
 0xc6d   :  { %821 = vrot.lane.b32.xlu1 %v2505_v45, %s2829_s9  ;;  %v2507_v31 = vpop.eup %2506 }
 0xc6e   :  { %v2509_v33 = vpop.eup %2508  ;;  %v807_v48 = vadd.f32 1.0, %v2507_v31 }
 0xc6f   :  { %v808_v34 = vadd.f32 1.0, %v2509_v33 }
 0xc70   :  { %2510 = vrcp.f32 %v807_v48 }
 0xc71   :  { %2512 = vrcp.f32 %v808_v34 }
 0xc7a   :  { %v2511_v35 = vpop.eup %2510 }
 0xc7b   :  { %v2513_v38 = vpop.eup %2512  ;;  %v815_v41 = vmul.f32 %v2511_v35, %v3145_v59 }
 0xc7c   :  { %v816_v46 = vmul.f32 %v2513_v38, %v3149_v62 }
 0xcdd   :  { %v820_v36 = vpop.permute.xlu0 %819 }
 0xcde   :  { %v825_v37 = vmul.f32 %v2511_v35, %v820_v36 }
 0xcdf   :  { %v822_v40 = vpop.permute.xlu1 %821 }
 0xce0   :  { %829 = vrot.lane.b32.xlu0 %v825_v37, %s2841_s5  ;;  %v826_v24 = vmul.f32 %v2513_v38, %v822_v40 }
 0xce2   :  { %831 = vrot.lane.b32.xlu1 %v826_v24, %s2841_s5 }
 0xd52   :  { %v830_v42 = vpop.permute.xlu0 %829 }
 0xd53   :  { %v3177_v43 = vadd.f32 %v830_v42, %v815_v41  ;;  %v3219_v41 = vld [vmem:[#allocation9 + $0x10] sm:$0xff]  }
 0xd54   :  { %v832_v47 = vpop.permute.xlu1 %831 }
 0xd55   :  { %2514 = vtanh.f32 %v3177_v43  ;;  %v3181_v50 = vadd.f32 %v832_v47, %v816_v46  ;;  %v1228_v46 = vld [vmem:[#allocation12 + $0x10] sm:$0xff]  ;;  %v1229_v47 = vld [vmem:[#allocation12 + $0x18] sm:$0xff] }
 0xd57   :  { %2516 = vtanh.f32 %v3181_v50 }
 0xd5f   :  { %v2515_v51 = vpop.eup %2514 }
 0xd60   :  { %841 = vrot.lane.b32.xlu0 %v2515_v51, %s2829_s9 }
 0xd61   :  { %v2517_v52 = vpop.eup %2516 }
 0xd62   :  { %843 = vrot.lane.b32.xlu1 %v2517_v52, %s2829_s9  ;;  %v1007_v52 = vunpack.c.l.bf16 %v3068_v49 }
 0xdd2   :  { %v842_v53 = vpop.permute.xlu0 %841 }
 0xdd3   :  { %v847_v17 = vmul.f32 %v2511_v35, %v842_v53 }
 0xdd4   :  { %v844_v55 = vpop.permute.xlu1 %843 }
 0xdd5   :  { %v848_v56 = vmul.f32 %v2513_v38, %v844_v55 }
 0xdd7   :  { %v849_v57 = vpack.c.bf16 %v848_v56, %v847_v17  ;;  %v1008_v56 = vunpack.c.h.bf16 %v3068_v49 }
 0xdd9   :  { %851 = vrot.lane.b32.xlu0 %v849_v57, %s2841_s5 }
 0xe4b   :  { %v852_v59 = vpop.permute.xlu0 %851 }
 0xe4c   :  { %855 = vst.msk [vmem:[#allocation2 + $0x20] sm:$0xff] %vm179_vm1, %v852_v59  ;;  %2308 = vmatmul.mubr.msk.bf16.vlgmr.msra.gmra.mrb[20].mxu1 %vm179_vm1, %v852_v59 }
 0xe4d   :  { %2312 = vmatpush3.bf16.msra.mxu1 %v2979_v3  ;;  %2315 = vmatprep.mubr.msk.bf16.mxu1 %vm2840_vm0, %v2839_v0 }
 0xe4e   :  { %2313 = vmatprep.subr.bf16.mxu1 %v2839_v0 }
 0xe51   :  { %2314 = vmatpush3.bf16.msra.mxu1 %v2983_v5 }
 0xe52   :  { %2351 = vmatprep.subr.bf16.mxu1 %v2839_v0 }
 0xe53   :  { %v1070_v60 = vld [vmem:[#allocation2 + $0x20] sm:$0xff] }
 0xe54   :  { %2340 = vmatmul.mubr.msk.bf16.gmra.mrb[44].mxu0 %vm179_vm1, %v1070_v60 }
 0xe55   :  { %2343 = vmatprep.mubr.msk.bf16.mxu0 %vm2840_vm0, %v2839_v0 }
 0xf1f   :  { %v895_v62 = vpop.f32.mrb[20].mxu1 }
 0xf20   :  { %v904_v11 = vadd.f32 %v902_v61, %v895_v62  ;;  %v2309_v3 = vpop.f32.mrb[21].mxu1  ;;  %v1291_v61 = vunpack.c.l.bf16 %v3074_v2 }
 0xf21   :  { %v898_v1 = vpop.f32.mrb[22].mxu1 }
 0xf22   :  { %2518 = vtanh.f32 %v904_v11  ;;  %v905_v4 = vadd.f32 %v903_v63, %v898_v1  ;;  %v2310_v6 = vpop.f32.mrb[23].mxu1  ;;  %v2105_v44 = vmul.f32 -1.442695, %v904_v11 }
 0xf24   :  { %2520 = vtanh.f32 %v905_v4  ;;  %v2106_v16 = vmul.f32 -1.442695, %v905_v4  ;;  %v1292_v4 = vunpack.c.h.bf16 %v3074_v2  ;;  %v1233_v2 = vld [vmem:[#allocation13 + $0x18] sm:$0xff] }
 0xf25   :  { %2522 = vpow2.f32 %v2105_v44 }
 0xf26   :  { %2524 = vpow2.f32 %v2106_v16 }
 0xf27   :  { %v1185_v5 = vpop.f32.mrb[44].mxu0 }
 0xf28   :  { %v2341_v7 = vpop.f32.mrb[45].mxu0  ;;  %v1186_v9 = vadd.f32 %v3070_v58, %v1185_v5 }
 0xf29   :  { %v1188_v8 = vpop.f32.mrb[46].mxu0 }
 0xf2a   :  { %v1189_v10 = vadd.f32 %v3070_v58, %v1188_v8  ;;  %v2342_v12 = vpop.f32.mrb[47].mxu0 }
 0xf2c   :  { %v2519_v13 = vpop.eup %2518  ;;  %v3202_v14 = vpack.c.bf16 %v1189_v10, %v1186_v9 }
 0xf2d   :  { %924 = vrot.lane.b32.xlu1 %v2519_v13, %s2829_s9 }
 0xf2e   :  { %v2521_v15 = vpop.eup %2520 }
 0xf2f   :  { %926 = vrot.lane.b32.xlu0 %v2521_v15, %s2829_s9  ;;  %v2523_v18 = vpop.eup %2522  ;;  %v1232_v15 = vld [vmem:[#allocation13 + $0x10] sm:$0xff] }
 0xf30   :  { %v2525_v19 = vpop.eup %2524  ;;  %v912_v20 = vadd.f32 1.0, %v2523_v18 }
 0xf31   :  { %v913_v21 = vadd.f32 1.0, %v2525_v19 }
 0xf32   :  { %2526 = vrcp.f32 %v912_v20 }
 0xf33   :  { %2528 = vrcp.f32 %v913_v21 }
 0xf3c   :  { %v2527_v22 = vpop.eup %2526 }
 0xf3d   :  { %v2529_v26 = vpop.eup %2528  ;;  %v920_v45 = vmul.f32 %v2527_v22, %v3177_v43  ;;  %v3224_v43 = vld [vmem:[#allocation9 + $0x18] sm:$0xff]  }
 0xf3e   :  { %v921_v31 = vmul.f32 %v2529_v26, %v3181_v50  ;;  %v1230_v50 = vpack.c.bf16 %v1229_v47, %v1228_v46 }
 0xf9f   :  { %v925_v23 = vpop.permute.xlu1 %924 }
 0xfa0   :  { %v930_v25 = vmul.f32 %v2527_v22, %v925_v23 }
 0xfa1   :  { %v927_v27 = vpop.permute.xlu0 %926 }
 0xfa2   :  { %934 = vrot.lane.b32.xlu1 %v930_v25, %s2841_s5  ;;  %v931_v28 = vmul.f32 %v2529_v26, %v927_v27 }
 0xfa4   :  { %936 = vrot.lane.b32.xlu0 %v931_v28, %s2841_s5 }
0x1014   :  { %v935_v32 = vpop.permute.xlu1 %934 }
0x1015   :  { %v3209_v30 = vadd.f32 %v935_v32, %v920_v45 }
0x1016   :  { %v937_v33 = vpop.permute.xlu0 %936 }
0x1017   :  { %2530 = vtanh.f32 %v3209_v30  ;;  %v3213_v48 = vadd.f32 %v937_v33, %v921_v31 }
0x1019   :  { %2532 = vtanh.f32 %v3213_v48 }
0x1021   :  { %v2531_v34 = vpop.eup %2530 }
0x1022   :  { %946 = vrot.lane.b32.xlu1 %v2531_v34, %s2829_s9 }
0x1023   :  { %v2533_v35 = vpop.eup %2532 }
0x1024   :  { %948 = vrot.lane.b32.xlu0 %v2533_v35, %s2829_s9 }
0x1094   :  { %v947_v36 = vpop.permute.xlu1 %946 }
0x1095   :  { %v952_v38 = vmul.f32 %v2527_v22, %v947_v36 }
0x1096   :  { %v949_v37 = vpop.permute.xlu0 %948 }
0x1097   :  { %v953_v40 = vmul.f32 %v2529_v26, %v949_v37 }
0x1099   :  { %v954_v24 = vpack.c.bf16 %v953_v40, %v952_v38 }
0x109b   :  { %956 = vrot.lane.b32.xlu1 %v954_v24, %s2841_s5 }
0x110d   :  { %v957_v42 = vpop.permute.xlu1 %956 }
0x110e   :  { %960 = vst.msk [vmem:[#allocation2 + $0x28] sm:$0xff] %vm179_vm1, %v957_v42  ;;  %2316 = vmatmul.mubr.msk.bf16.vlgmr.msra.gmra.mrb[24].mxu1 %vm179_vm1, %v957_v42 }
0x110f   :  { %2352 = vmatpush3.bf16.msra.mxu1 %v3219_v41  ;;  %2355 = vmatprep.mubr.msk.bf16.mxu1 %vm2840_vm0, %v2839_v0 }
0x1110   :  { %2353 = vmatprep.subr.bf16.mxu1 %v2839_v0 }
0x1113   :  { %2354 = vmatpush3.bf16.msra.mxu1 %v3224_v43 }
0x1114   :  { %2359 = vmatprep.subr.bf16.mxu1 %v2839_v0 }
0x1115   :  { %v1071_v51 = vld [vmem:[#allocation2 + $0x28] sm:$0xff] }
0x1116   :  { %2344 = vmatmul.mubr.msk.bf16.gmra.mrb[48].mxu0 %vm179_vm1, %v1071_v51  ;;  %2356 = vmatmul.mubr.msk.bf16.vlgmr.msra.gmra.mrb[28].mxu1 %vm179_vm1, %v1230_v50 }
0x1117   :  { %2360 = vmatpush3.bf16.msra.mxu1 %v3219_v41  ;;  %2363 = vmatprep.mubr.msk.bf16.mxu1 %vm2840_vm0, %v2839_v0 }
0x1118   :  { %2361 = vmatprep.subr.bf16.mxu1 %v2839_v0  ;;  %2347 = vmatprep.mubr.msk.bf16.mxu0 %vm2840_vm0, %v2839_v0 }
0x111b   :  { %2362 = vmatpush3.bf16.msra.mxu1 %v3224_v43 }
0x111c   :  { %2367 = vmatprep.subr.bf16.mxu1 %v2839_v0 }
0x11e1   :  { %v1000_v53 = vpop.f32.mrb[24].mxu1 }
0x11e2   :  { %v3242_v55 = vadd.f32 %v1007_v52, %v1000_v53  ;;  %v2317_v17 = vpop.f32.mrb[25].mxu1  ;;  %v1413_v52 = vunpack.c.l.bf16 %v3106_v54 }
0x11e3   :  { %v1003_v57 = vpop.f32.mrb[26].mxu1 }
0x11e4   :  { %v3245_v59 = vadd.f32 %v1008_v56, %v1003_v57  ;;  %v2318_v60 = vpop.f32.mrb[27].mxu1  ;;  %v1414_v57 = vunpack.c.h.bf16 %v3106_v54 }
0x11e9   :  { %v1193_v62 = vpop.f32.mrb[48].mxu0  ;;  %v1284_v11 = vpop.f32.mrb[28].mxu1 }
0x11ea   :  { %v1293_v3 = vadd.f32 %v1291_v61, %v1284_v11  ;;  %v2345_v63 = vpop.f32.mrb[49].mxu0  ;;  %v2357_v1 = vpop.f32.mrb[29].mxu1  ;;  %v1194_v7 = vadd.f32 %v3070_v58, %v1193_v62 }
0x11eb   :  { %v1196_v6 = vpop.f32.mrb[50].mxu0  ;;  %v1287_v5 = vpop.f32.mrb[30].mxu1 }
0x11ec   :  { %2534 = vtanh.f32 %v1293_v3  ;;  %v1197_v49 = vadd.f32 %v3070_v58, %v1196_v6  ;;  %v1294_v8 = vadd.f32 %v1292_v4, %v1287_v5  ;;  %v2346_v9 = vpop.f32.mrb[51].mxu0  ;;  %v2358_v10 = vpop.f32.mrb[31].mxu1  ;;  %v2123_v16 = vmul.f32 -1.442695, %v1293_v3 }
0x11ee   :  { %v3251_v12 = vpack.c.bf16 %v1197_v49, %v1194_v7  ;;  %2536 = vtanh.f32 %v1294_v8  ;;  %v2124_v58 = vmul.f32 -1.442695, %v1294_v8 }
0x11ef   :  { %2538 = vpow2.f32 %v2123_v16 }
0x11f0   :  { %2540 = vpow2.f32 %v2124_v58 }
0x11f6   :  { %v2535_v13 = vpop.eup %2534 }
0x11f7   :  { %1321 = vrot.lane.b32.xlu0 %v2535_v13, %s2829_s9 }
0x11f8   :  { %v2537_v44 = vpop.eup %2536 }
0x11f9   :  { %1323 = vrot.lane.b32.xlu1 %v2537_v44, %s2829_s9  ;;  %v2539_v18 = vpop.eup %2538 }
0x11fa   :  { %v2541_v19 = vpop.eup %2540  ;;  %v1301_v20 = vadd.f32 1.0, %v2539_v18 }
0x11fb   :  { %1311 = vrot.lane.b32.xlu0 %v1232_v15, %s2841_s5  ;;  %v1302_v21 = vadd.f32 1.0, %v2541_v19 }
0x11fc   :  { %2542 = vrcp.f32 %v1301_v20 }
0x11fd   :  { %1313 = vrot.lane.b32.xlu1 %v1233_v2, %s2841_s5  ;;  %2544 = vrcp.f32 %v1302_v21 }
0x1206   :  { %v2543_v22 = vpop.eup %2542 }
0x1207   :  { %v2545_v26 = vpop.eup %2544 }
0x1269   :  { %v1322_v23 = vpop.permute.xlu0 %1321 }
0x126a   :  { %v1327_v25 = vmul.f32 %v2543_v22, %v1322_v23 }
0x126b   :  { %v1324_v27 = vpop.permute.xlu1 %1323 }
0x126c   :  { %1331 = vrot.lane.b32.xlu0 %v1327_v25, %s2841_s5  ;;  %v1328_v28 = vmul.f32 %v2545_v26, %v1324_v27 }
0x126d   :  { %v1312_v45 = vpop.permute.xlu0 %1311 }
0x126e   :  { %1333 = vrot.lane.b32.xlu1 %v1328_v28, %s2841_s5  ;;  %v1317_v32 = vmul.f32 %v2543_v22, %v1312_v45  ;;  %v1527_v28 = vunpack.c.l.bf16 %v3138_v39 }
0x126f   :  { %v1314_v31 = vpop.permute.xlu1 %1313 }
0x1270   :  { %v1318_v35 = vmul.f32 %v2545_v26, %v1314_v31 }
0x12de   :  { %v1332_v33 = vpop.permute.xlu0 %1331 }
0x12df   :  { %v1337_v34 = vadd.f32 %v1332_v33, %v1317_v32  ;;  %v1528_v33 = vunpack.c.h.bf16 %v3138_v39 }
0x12e0   :  { %v1334_v36 = vpop.permute.xlu1 %1333 }
0x12e1   :  { %2546 = vtanh.f32 %v1337_v34  ;;  %v1338_v37 = vadd.f32 %v1334_v36, %v1318_v35 }
0x12e3   :  { %2548 = vtanh.f32 %v1338_v37 }
0x12eb   :  { %v2547_v38 = vpop.eup %2546 }
0x12ec   :  { %1343 = vrot.lane.b32.xlu0 %v2547_v38, %s2829_s9 }
0x12ed   :  { %v2549_v40 = vpop.eup %2548 }
0x12ee   :  { %1345 = vrot.lane.b32.xlu1 %v2549_v40, %s2829_s9 }
0x135e   :  { %v1344_v24 = vpop.permute.xlu0 %1343 }
0x135f   :  { %v3261_v46 = vmul.f32 %v2543_v22, %v1344_v24 }
0x1360   :  { %v1346_v42 = vpop.permute.xlu1 %1345 }
0x1361   :  { %v3263_v47 = vmul.f32 %v2545_v26, %v1346_v42 }
0x1363   :  { %v1351_v50 = vpack.c.bf16 %v3263_v47, %v3261_v46 }
0x1365   :  { %1367 = vrot.lane.b32.xlu0 %v1351_v50, %s2841_s5 }
0x13d7   :  { %v1368_v51 = vpop.permute.xlu0 %1367 }
0x13d8   :  { %2364 = vmatmul.mubr.msk.bf16.vlgmr.msra.gmra.mrb[32].mxu1 %vm179_vm1, %v1368_v51 }
0x13d9   :  { %2368 = vmatpush3.bf16.msra.mxu1 %v3219_v41  ;;  %2371 = vmatprep.mubr.msk.bf16.mxu1 %vm2840_vm0, %v2839_v0 }
0x13da   :  { %2369 = vmatprep.subr.bf16.mxu1 %v2839_v0 }
0x13dd   :  { %2370 = vmatpush3.bf16.msra.mxu1 %v3224_v43 }
0x13de   :  { %2375 = vmatprep.subr.bf16.mxu1 %v2839_v0 }
0x14ab   :  { %v1406_v53 = vpop.f32.mrb[32].mxu1 }
0x14ac   :  { %v1415_v17 = vadd.f32 %v1413_v52, %v1406_v53  ;;  %v2365_v56 = vpop.f32.mrb[33].mxu1 }
0x14ad   :  { %v1409_v60 = vpop.f32.mrb[34].mxu1 }
0x14ae   :  { %2550 = vtanh.f32 %v1415_v17  ;;  %v1416_v61 = vadd.f32 %v1414_v57, %v1409_v60  ;;  %v2366_v62 = vpop.f32.mrb[35].mxu1  ;;  %v2128_v63 = vmul.f32 -1.442695, %v1415_v17 }
0x14b0   :  { %2552 = vtanh.f32 %v1416_v61  ;;  %v2129_v1 = vmul.f32 -1.442695, %v1416_v61 }
0x14b1   :  { %2554 = vpow2.f32 %v2128_v63 }
0x14b2   :  { %2556 = vpow2.f32 %v2129_v1 }
0x14b8   :  { %v2551_v11 = vpop.eup %2550 }
0x14b9   :  { %1435 = vrot.lane.b32.xlu1 %v2551_v11, %s2829_s9 }
0x14ba   :  { %v2553_v3 = vpop.eup %2552 }
0x14bb   :  { %1437 = vrot.lane.b32.xlu0 %v2553_v3, %s2829_s9  ;;  %v2555_v4 = vpop.eup %2554 }
0x14bc   :  { %v2557_v6 = vpop.eup %2556  ;;  %v1423_v5 = vadd.f32 1.0, %v2555_v4 }
0x14bd   :  { %v1424_v7 = vadd.f32 1.0, %v2557_v6 }
0x14be   :  { %2558 = vrcp.f32 %v1423_v5 }
0x14bf   :  { %2560 = vrcp.f32 %v1424_v7 }
0x14c8   :  { %v2559_v54 = vpop.eup %2558 }
0x14c9   :  { %v2561_v9 = vpop.eup %2560  ;;  %v1431_v15 = vmul.f32 %v2559_v54, %v1337_v34 }
0x14ca   :  { %v1432_v16 = vmul.f32 %v2561_v9, %v1338_v37 }
0x152b   :  { %v1436_v49 = vpop.permute.xlu1 %1435 }
0x152c   :  { %v1441_v8 = vmul.f32 %v2559_v54, %v1436_v49 }
0x152d   :  { %v1438_v10 = vpop.permute.xlu0 %1437 }
0x152e   :  { %1445 = vrot.lane.b32.xlu1 %v1441_v8, %s2841_s5  ;;  %v1442_v13 = vmul.f32 %v2561_v9, %v1438_v10  ;;  %v1641_v10 = vunpack.c.l.bf16 %v3170_v29 }
0x1530   :  { %1447 = vrot.lane.b32.xlu0 %v1442_v13, %s2841_s5 }
0x15a0   :  { %v1446_v44 = vpop.permute.xlu1 %1445 }
0x15a1   :  { %v1451_v2 = vadd.f32 %v1446_v44, %v1431_v15 }
0x15a2   :  { %v1448_v58 = vpop.permute.xlu0 %1447 }
0x15a3   :  { %2562 = vtanh.f32 %v1451_v2  ;;  %v1452_v18 = vadd.f32 %v1448_v58, %v1432_v16 }
0x15a5   :  { %2564 = vtanh.f32 %v1452_v18 }
0x15ad   :  { %v2563_v19 = vpop.eup %2562 }
0x15ae   :  { %1457 = vrot.lane.b32.xlu1 %v2563_v19, %s2829_s9 }
0x15af   :  { %v2565_v20 = vpop.eup %2564 }
0x15b0   :  { %1459 = vrot.lane.b32.xlu0 %v2565_v20, %s2829_s9 }
0x1620   :  { %v1458_v21 = vpop.permute.xlu1 %1457 }
0x1621   :  { %v3283_v23 = vmul.f32 %v2559_v54, %v1458_v21 }
0x1622   :  { %v1460_v22 = vpop.permute.xlu0 %1459 }
0x1623   :  { %v3285_v25 = vmul.f32 %v2561_v9, %v1460_v22 }
0x1625   :  { %v1465_v26 = vpack.c.bf16 %v3285_v25, %v3283_v23 }
0x1627   :  { %1481 = vrot.lane.b32.xlu1 %v1465_v26, %s2841_s5 }
0x1699   :  { %v1482_v27 = vpop.permute.xlu1 %1481 }
0x169a   :  { %2372 = vmatmul.mubr.msk.bf16.vlgmr.msra.gmra.mrb[36].mxu1 %vm179_vm1, %v1482_v27 }
0x169b   :  { %2376 = vmatpush3.bf16.msra.mxu1 %v3219_v41  ;;  %2379 = vmatprep.mubr.msk.bf16.mxu1 %vm2840_vm0, %v2839_v0 }
0x169c   :  { %2377 = vmatprep.subr.bf16.mxu1 %v2839_v0 }
0x169f   :  { %2378 = vmatpush3.bf16.msra.mxu1 %v3224_v43 }
0x16a0   :  { %2383 = vmatprep.subr.bf16.mxu1 %v2839_v0 }
0x176d   :  { %v1520_v45 = vpop.f32.mrb[36].mxu1 }
0x176e   :  { %v1529_v32 = vadd.f32 %v1527_v28, %v1520_v45  ;;  %v2373_v31 = vpop.f32.mrb[37].mxu1 }
0x176f   :  { %v1523_v34 = vpop.f32.mrb[38].mxu1 }
0x1770   :  { %2566 = vtanh.f32 %v1529_v32  ;;  %v1530_v35 = vadd.f32 %v1528_v33, %v1523_v34  ;;  %v2374_v36 = vpop.f32.mrb[39].mxu1  ;;  %v2133_v40 = vmul.f32 -1.442695, %v1529_v32 }
0x1772   :  { %2568 = vtanh.f32 %v1530_v35  ;;  %v2134_v24 = vmul.f32 -1.442695, %v1530_v35 }
0x1773   :  { %2570 = vpow2.f32 %v2133_v40 }
0x1774   :  { %2572 = vpow2.f32 %v2134_v24 }
0x177a   :  { %v2567_v37 = vpop.eup %2566 }
0x177b   :  { %1549 = vrot.lane.b32.xlu0 %v2567_v37, %s2829_s9 }
0x177c   :  { %v2569_v38 = vpop.eup %2568 }
0x177d   :  { %1551 = vrot.lane.b32.xlu1 %v2569_v38, %s2829_s9  ;;  %v2571_v42 = vpop.eup %2570 }
0x177e   :  { %v2573_v50 = vpop.eup %2572  ;;  %v1537_v51 = vadd.f32 1.0, %v2571_v42 }
0x177f   :  { %v1538_v52 = vadd.f32 1.0, %v2573_v50 }
0x1780   :  { %2574 = vrcp.f32 %v1537_v51 }
0x1781   :  { %2576 = vrcp.f32 %v1538_v52 }
0x178a   :  { %v2575_v39 = vpop.eup %2574 }
0x178b   :  { %v2577_v56 = vpop.eup %2576  ;;  %v1545_v61 = vmul.f32 %v2575_v39, %v1451_v2  ;;  %v1642_v2 = vunpack.c.h.bf16 %v3170_v29 }
0x178c   :  { %v1546_v3 = vmul.f32 %v2577_v56, %v1452_v18 }
0x17ed   :  { %v1550_v53 = vpop.permute.xlu0 %1549 }
0x17ee   :  { %v1555_v17 = vmul.f32 %v2575_v39, %v1550_v53 }
0x17ef   :  { %v1552_v57 = vpop.permute.xlu1 %1551 }
0x17f0   :  { %1559 = vrot.lane.b32.xlu0 %v1555_v17, %s2841_s5  ;;  %v1556_v60 = vmul.f32 %v2577_v56, %v1552_v57 }
0x17f2   :  { %1561 = vrot.lane.b32.xlu1 %v1556_v60, %s2841_s5  ;;  %v1755_v60 = vunpack.c.l.bf16 %v3202_v14 }
0x1862   :  { %v1560_v62 = vpop.permute.xlu0 %1559 }
0x1863   :  { %v1565_v11 = vadd.f32 %v1560_v62, %v1545_v61 }
0x1864   :  { %v1562_v63 = vpop.permute.xlu1 %1561 }
0x1865   :  { %2578 = vtanh.f32 %v1565_v11  ;;  %v1566_v1 = vadd.f32 %v1562_v63, %v1546_v3  ;;  %v1756_v3 = vunpack.c.h.bf16 %v3202_v14 }
0x1867   :  { %2580 = vtanh.f32 %v1566_v1 }
0x186f   :  { %v2579_v4 = vpop.eup %2578 }
0x1870   :  { %1571 = vrot.lane.b32.xlu0 %v2579_v4, %s2829_s9 }
0x1871   :  { %v2581_v6 = vpop.eup %2580 }
0x1872   :  { %1573 = vrot.lane.b32.xlu1 %v2581_v6, %s2829_s9 }
0x18e2   :  { %v1572_v5 = vpop.permute.xlu0 %1571 }
0x18e3   :  { %v3305_v54 = vmul.f32 %v2575_v39, %v1572_v5 }
0x18e4   :  { %v1574_v7 = vpop.permute.xlu1 %1573 }
0x18e5   :  { %v3307_v49 = vmul.f32 %v2577_v56, %v1574_v7 }
0x18e7   :  { %v1579_v8 = vpack.c.bf16 %v3307_v49, %v3305_v54 }
0x18e9   :  { %1595 = vrot.lane.b32.xlu0 %v1579_v8, %s2841_s5 }
0x195b   :  { %v1596_v9 = vpop.permute.xlu0 %1595 }
0x195c   :  { %2380 = vmatmul.mubr.msk.bf16.vlgmr.msra.gmra.mrb[40].mxu1 %vm179_vm1, %v1596_v9 }
0x195d   :  { %2384 = vmatpush3.bf16.msra.mxu1 %v3219_v41  ;;  %2387 = vmatprep.mubr.msk.bf16.mxu1 %vm2840_vm0, %v2839_v0 }
0x195e   :  { %2385 = vmatprep.subr.bf16.mxu1 %v2839_v0 }
0x1961   :  { %2386 = vmatpush3.bf16.msra.mxu1 %v3224_v43 }
0x1962   :  { %2391 = vmatprep.subr.bf16.mxu1 %v2839_v0 }
0x1a2f   :  { %v1634_v13 = vpop.f32.mrb[40].mxu1 }
0x1a30   :  { %v1643_v15 = vadd.f32 %v1641_v10, %v1634_v13  ;;  %v2381_v44 = vpop.f32.mrb[41].mxu1 }
0x1a31   :  { %v1637_v16 = vpop.f32.mrb[42].mxu1 }
0x1a32   :  { %2582 = vtanh.f32 %v1643_v15  ;;  %v1644_v58 = vadd.f32 %v1642_v2, %v1637_v16  ;;  %v2382_v18 = vpop.f32.mrb[43].mxu1  ;;  %v2138_v21 = vmul.f32 -1.442695, %v1643_v15 }
0x1a34   :  { %2584 = vtanh.f32 %v1644_v58  ;;  %v2139_v22 = vmul.f32 -1.442695, %v1644_v58 }
0x1a35   :  { %2586 = vpow2.f32 %v2138_v21 }
0x1a36   :  { %2588 = vpow2.f32 %v2139_v22 }
0x1a3c   :  { %v2583_v19 = vpop.eup %2582 }
0x1a3d   :  { %1663 = vrot.lane.b32.xlu1 %v2583_v19, %s2829_s9 }
0x1a3e   :  { %v2585_v20 = vpop.eup %2584 }
0x1a3f   :  { %1665 = vrot.lane.b32.xlu0 %v2585_v20, %s2829_s9  ;;  %v2587_v26 = vpop.eup %2586 }
0x1a40   :  { %v2589_v27 = vpop.eup %2588  ;;  %v1651_v28 = vadd.f32 1.0, %v2587_v26 }
0x1a41   :  { %v1652_v45 = vadd.f32 1.0, %v2589_v27 }
0x1a42   :  { %2590 = vrcp.f32 %v1651_v28 }
0x1a43   :  { %2592 = vrcp.f32 %v1652_v45 }
0x1a4c   :  { %v2591_v29 = vpop.eup %2590 }
0x1a4d   :  { %v2593_v33 = vpop.eup %2592  ;;  %v1659_v36 = vmul.f32 %v2591_v29, %v1565_v11 }
0x1a4e   :  { %v1660_v40 = vmul.f32 %v2593_v33, %v1566_v1 }
0x1aaf   :  { %v1664_v32 = vpop.permute.xlu1 %1663 }
0x1ab0   :  { %v1669_v31 = vmul.f32 %v2591_v29, %v1664_v32 }
0x1ab1   :  { %v1666_v34 = vpop.permute.xlu0 %1665 }
0x1ab2   :  { %1673 = vrot.lane.b32.xlu1 %v1669_v31, %s2841_s5  ;;  %v1670_v35 = vmul.f32 %v2593_v33, %v1666_v34 }
0x1ab4   :  { %1675 = vrot.lane.b32.xlu0 %v1670_v35, %s2841_s5 }
0x1b24   :  { %v1674_v37 = vpop.permute.xlu1 %1673 }
0x1b25   :  { %v1679_v38 = vadd.f32 %v1674_v37, %v1659_v36 }
0x1b26   :  { %v1676_v24 = vpop.permute.xlu0 %1675 }
0x1b27   :  { %2594 = vtanh.f32 %v1679_v38  ;;  %v1680_v42 = vadd.f32 %v1676_v24, %v1660_v40  ;;  %v2109_v40 = vmul.f32 -1.442695, %v3245_v59 }
0x1b29   :  { %2596 = vtanh.f32 %v1680_v42 }
0x1b31   :  { %v2595_v50 = vpop.eup %2594 }
0x1b32   :  { %1685 = vrot.lane.b32.xlu1 %v2595_v50, %s2829_s9 }
0x1b33   :  { %v2597_v51 = vpop.eup %2596 }
0x1b34   :  { %1687 = vrot.lane.b32.xlu0 %v2597_v51, %s2829_s9 }
0x1ba4   :  { %v1686_v52 = vpop.permute.xlu1 %1685 }
0x1ba5   :  { %v3327_v53 = vmul.f32 %v2591_v29, %v1686_v52 }
0x1ba6   :  { %v1688_v39 = vpop.permute.xlu0 %1687 }
0x1ba7   :  { %v3329_v17 = vmul.f32 %v2593_v33, %v1688_v39 }
0x1ba9   :  { %v1693_v56 = vpack.c.bf16 %v3329_v17, %v3327_v53 }
0x1bab   :  { %1709 = vrot.lane.b32.xlu1 %v1693_v56, %s2841_s5  ;;  %v1870_v56 = vunpack.c.h.bf16 %v3251_v12 }
0x1c1d   :  { %v1710_v57 = vpop.permute.xlu1 %1709 }
0x1c1e   :  { %2388 = vmatmul.mubr.msk.bf16.vlgmr.msra.gmra.mrb[44].mxu1 %vm179_vm1, %v1710_v57 }
0x1c1f   :  { %2392 = vmatpush3.bf16.msra.mxu1 %v3219_v41  ;;  %2395 = vmatprep.mubr.msk.bf16.mxu1 %vm2840_vm0, %v2839_v0 }
0x1c20   :  { %2393 = vmatprep.subr.bf16.mxu1 %v2839_v0 }
0x1c23   :  { %2394 = vmatpush3.bf16.msra.mxu1 %v3224_v43 }
0x1c24   :  { %2399 = vmatprep.subr.bf16.mxu1 %v2839_v0 }
0x1cf1   :  { %v1748_v61 = vpop.f32.mrb[44].mxu1 }
0x1cf2   :  { %v1757_v62 = vadd.f32 %v1755_v60, %v1748_v61  ;;  %v2389_v11 = vpop.f32.mrb[45].mxu1 }
0x1cf3   :  { %v1751_v63 = vpop.f32.mrb[46].mxu1 }
0x1cf4   :  { %2598 = vtanh.f32 %v1757_v62  ;;  %v1758_v1 = vadd.f32 %v1756_v3, %v1751_v63  ;;  %v2390_v4 = vpop.f32.mrb[47].mxu1  ;;  %v2143_v7 = vmul.f32 -1.442695, %v1757_v62 }
0x1cf6   :  { %2600 = vtanh.f32 %v1758_v1  ;;  %v2144_v8 = vmul.f32 -1.442695, %v1758_v1 }
0x1cf7   :  { %2602 = vpow2.f32 %v2143_v7 }
0x1cf8   :  { %2604 = vpow2.f32 %v2144_v8 }
0x1cfe   :  { %v2599_v6 = vpop.eup %2598 }
0x1cff   :  { %1777 = vrot.lane.b32.xlu0 %v2599_v6, %s2829_s9 }
0x1d00   :  { %v2601_v5 = vpop.eup %2600 }
0x1d01   :  { %1779 = vrot.lane.b32.xlu1 %v2601_v5, %s2829_s9  ;;  %v2603_v9 = vpop.eup %2602 }
0x1d02   :  { %v2605_v10 = vpop.eup %2604  ;;  %v1765_v13 = vadd.f32 1.0, %v2603_v9 }
0x1d03   :  { %v1766_v15 = vadd.f32 1.0, %v2605_v10 }
0x1d04   :  { %2606 = vrcp.f32 %v1765_v13 }
0x1d05   :  { %2608 = vrcp.f32 %v1766_v15 }
0x1d0e   :  { %v2607_v14 = vpop.eup %2606 }
0x1d0f   :  { %v2609_v16 = vpop.eup %2608  ;;  %v1773_v19 = vmul.f32 %v2607_v14, %v1679_v38  ;;  %v2108_v38 = vmul.f32 -1.442695, %v3242_v55 }
0x1d10   :  { %v1774_v22 = vmul.f32 %v2609_v16, %v1680_v42  ;;  %v1869_v42 = vunpack.c.l.bf16 %v3251_v12 }
0x1d71   :  { %v1778_v44 = vpop.permute.xlu0 %1777 }
0x1d72   :  { %v1783_v2 = vmul.f32 %v2607_v14, %v1778_v44 }
0x1d73   :  { %v1780_v58 = vpop.permute.xlu1 %1779 }
0x1d74   :  { %1787 = vrot.lane.b32.xlu0 %v1783_v2, %s2841_s5  ;;  %v1784_v18 = vmul.f32 %v2609_v16, %v1780_v58 }
0x1d76   :  { %1789 = vrot.lane.b32.xlu1 %v1784_v18, %s2841_s5 }
0x1de6   :  { %v1788_v20 = vpop.permute.xlu0 %1787 }
0x1de7   :  { %v3347_v21 = vadd.f32 %v1788_v20, %v1773_v19 }
0x1de8   :  { %v1790_v26 = vpop.permute.xlu1 %1789 }
0x1de9   :  { %2610 = vtanh.f32 %v3347_v21  ;;  %v3350_v27 = vadd.f32 %v1790_v26, %v1774_v22 }
0x1deb   :  { %2612 = vtanh.f32 %v3350_v27 }
0x1dec   :  { %2614 = vtanh.f32 %v3242_v55 }
0x1ded   :  { %2616 = vtanh.f32 %v3245_v59 }
0x1dee   :  { %2618 = vpow2.f32 %v2108_v38 }
0x1def   :  { %2620 = vpow2.f32 %v2109_v40 }
0x1df3   :  { %v2611_v28 = vpop.eup %2610 }
0x1df4   :  { %1799 = vrot.lane.b32.xlu0 %v2611_v28, %s2829_s9 }
0x1df5   :  { %v2613_v45 = vpop.eup %2612 }
0x1df6   :  { %1801 = vrot.lane.b32.xlu1 %v2613_v45, %s2829_s9  ;;  %v2615_v29 = vpop.eup %2614 }
0x1df7   :  { %v2617_v36 = vpop.eup %2616 }
0x1df8   :  { %v2619_v24 = vpop.eup %2618 }
0x1df9   :  { %v2621_v51 = vpop.eup %2620  ;;  %v1017_v52 = vadd.f32 1.0, %v2619_v24 }
0x1dfa   :  { %1029 = vrot.lane.b32.xlu1 %v2615_v29, %s2829_s9  ;;  %v1018_v60 = vadd.f32 1.0, %v2621_v51 }
0x1e66   :  { %v1800_v32 = vpop.permute.xlu0 %1799 }
0x1e67   :  { %v3358_v33 = vmul.f32 %v2607_v14, %v1800_v32 }
0x1e68   :  { %v1802_v31 = vpop.permute.xlu1 %1801 }
0x1e69   :  { %v3360_v34 = vmul.f32 %v2609_v16, %v1802_v31 }
0x1e6b   :  { %v1807_v35 = vpack.c.bf16 %v3360_v34, %v3358_v33 }
0x1e6c   :  { %v1030_v59 = vpop.permute.xlu1 %1029 }
0x1e6d   :  { %1823 = vrot.lane.b32.xlu0 %v1807_v35, %s2841_s5 }
0x1e71   :  { %1031 = vrot.lane.b32.xlu0 %v2617_v36, %s2829_s9 }
0x1edf   :  { %v1824_v37 = vpop.permute.xlu0 %1823 }
0x1ee0   :  { %2396 = vmatmul.mubr.msk.bf16.vlgmr.msra.gmra.mrb[48].mxu1 %vm179_vm1, %v1824_v37 }
0x1ee1   :  { %2400 = vmatpush3.bf16.msra.mxu1 %v3219_v41  ;;  %2403 = vmatprep.mubr.msk.bf16.mxu1 %vm2840_vm0, %v2839_v0 }
0x1ee2   :  { %2401 = vmatprep.subr.bf16.mxu1 %v2839_v0 }
0x1ee3   :  { %v1032_v3 = vpop.permute.xlu0 %1031 }
0x1ee5   :  { %2402 = vmatpush3.bf16.msra.mxu1 %v3224_v43 }
0x1fb3   :  { %v1862_v50 = vpop.f32.mrb[48].mxu1 }
0x1fb4   :  { %v1871_v41 = vadd.f32 %v1869_v42, %v1862_v50  ;;  %v2397_v39 = vpop.f32.mrb[49].mxu1 }
0x1fb5   :  { %v1865_v57 = vpop.f32.mrb[50].mxu1 }
0x1fb6   :  { %2622 = vtanh.f32 %v1871_v41  ;;  %v1872_v0 = vadd.f32 %v1870_v56, %v1865_v57  ;;  %v2398_v43 = vpop.f32.mrb[51].mxu1  ;;  %v2148_v1 = vmul.f32 -1.442695, %v1871_v41 }
0x1fb7   :  { %2624 = vrcp.f32 %v1017_v52  ;;  %v2662_v43 = vld [vmem:[#allocation10 + $0x1] ss:$0 sm:$0xff] }
0x1fb8   :  { %2626 = vtanh.f32 %v1872_v0  ;;  %v2149_v4 = vmul.f32 -1.442695, %v1872_v0 }
0x1fb9   :  { %2628 = vrcp.f32 %v1018_v60 }
0x1fba   :  { %2630 = vpow2.f32 %v2148_v1 }
0x1fbb   :  { %2632 = vpow2.f32 %v2149_v4 }
0x1fc0   :  { %v2623_v55 = vpop.eup %2622 }
0x1fc1   :  { %1891 = vrot.lane.b32.xlu1 %v2623_v55, %s2829_s9  ;;  %v2625_v61 = vpop.eup %2624 }
0x1fc2   :  { %v2627_v62 = vpop.eup %2626  ;;  %v1035_v11 = vmul.f32 %v2625_v61, %v1030_v59  ;;  %v1025_v44 = vmul.f32 %v2625_v61, %v3209_v30 }
0x1fc3   :  { %1893 = vrot.lane.b32.xlu0 %v2627_v62, %s2829_s9  ;;  %v2629_v63 = vpop.eup %2628 }
0x1fc4   :  { %v1036_v12 = vmul.f32 %v2629_v63, %v1032_v3  ;;  %v2631_v6 = vpop.eup %2630  ;;  %v1026_v18 = vmul.f32 %v2629_v63, %v3213_v48 }
0x1fc5   :  { %1039 = vrot.lane.b32.xlu1 %v1035_v11, %s2841_s5  ;;  %v2633_v5 = vpop.eup %2632  ;;  %v1879_v7 = vadd.f32 1.0, %v2631_v6 }
0x1fc6   :  { %v1880_v8 = vadd.f32 1.0, %v2633_v5 }
0x1fc7   :  { %1041 = vrot.lane.b32.xlu0 %v1036_v12, %s2841_s5  ;;  %2634 = vrcp.f32 %v1879_v7 }
0x1fc8   :  { %2636 = vrcp.f32 %v1880_v8 }
0x1fd1   :  { %v2635_v9 = vpop.eup %2634 }
0x1fd2   :  { %v2637_v15 = vpop.eup %2636  ;;  %v1887_v28 = vmul.f32 %v2635_v9, %v3347_v21 }
0x1fd3   :  { %v1888_v29 = vmul.f32 %v2637_v15, %v3350_v27 }
0x2033   :  { %v1892_v10 = vpop.permute.xlu1 %1891 }
0x2034   :  { %v1897_v13 = vmul.f32 %v2635_v9, %v1892_v10 }
0x2035   :  { %v1894_v14 = vpop.permute.xlu0 %1893 }
0x2036   :  { %1901 = vrot.lane.b32.xlu1 %v1897_v13, %s2841_s5  ;;  %v1898_v2 = vmul.f32 %v2637_v15, %v1894_v14 }
0x2037   :  { %v1040_v16 = vpop.permute.xlu1 %1039 }
0x2038   :  { %v1045_v58 = vadd.f32 %v1040_v16, %v1025_v44  ;;  %1903 = vrot.lane.b32.xlu0 %v1898_v2, %s2841_s5 }
0x2039   :  { %v1042_v19 = vpop.permute.xlu0 %1041 }
0x203a   :  { %2638 = vtanh.f32 %v1045_v58  ;;  %v1046_v20 = vadd.f32 %v1042_v19, %v1026_v18 }
0x203c   :  { %2640 = vtanh.f32 %v1046_v20 }
0x2044   :  { %v2639_v22 = vpop.eup %2638 }
0x2045   :  { %1051 = vrot.lane.b32.xlu1 %v2639_v22, %s2829_s9 }
0x2046   :  { %v2641_v26 = vpop.eup %2640 }
0x2047   :  { %1053 = vrot.lane.b32.xlu0 %v2641_v26, %s2829_s9 }
0x20a8   :  { %v1902_v30 = vpop.permute.xlu1 %1901 }
0x20a9   :  { %v3387_v45 = vadd.f32 %v1902_v30, %v1887_v28 }
0x20aa   :  { %v1904_v48 = vpop.permute.xlu0 %1903 }
0x20ab   :  { %2642 = vtanh.f32 %v3387_v45  ;;  %v3391_v32 = vadd.f32 %v1904_v48, %v1888_v29 }
0x20ad   :  { %2644 = vtanh.f32 %v3391_v32 }
0x20b5   :  { %v2643_v31 = vpop.eup %2642 }
0x20b6   :  { %1913 = vrot.lane.b32.xlu1 %v2643_v31, %s2829_s9 }
0x20b7   :  { %v2645_v35 = vpop.eup %2644  ;;  %v1052_v36 = vpop.permute.xlu1 %1051 }
0x20b8   :  { %1915 = vrot.lane.b32.xlu0 %v2645_v35, %s2829_s9  ;;  %v1057_v37 = vmul.f32 %v2625_v61, %v1052_v36  ;;  %v2157_v35 = vpack.c.bf16 %v3261_v46, %v3261_v46  ;;  %v2160_v36 = vpack.c.bf16 %v3285_v25, %v3285_v25  ;;  %v2161_v46 = vpack.c.bf16 %v3305_v54, %v3305_v54 }
0x20b9   :  { %v1054_v21 = vpop.permute.xlu0 %1053  ;;  %v2164_v25 = vpack.c.bf16 %v3329_v17, %v3329_v17  ;;  %v2165_v54 = vpack.c.bf16 %v3358_v33, %v3358_v33 }
0x20ba   :  { %v1058_v38 = vmul.f32 %v2629_v63, %v1054_v21 }
0x20bc   :  { %v1059_v40 = vpack.c.bf16 %v1058_v38, %v1057_v37 }
0x20be   :  { %1061 = vrot.lane.b32.xlu1 %v1059_v40, %s2841_s5 }
0x2128   :  { %v1914_v27 = vpop.permute.xlu1 %1913 }
0x2129   :  { %v3397_v42 = vmul.f32 %v2635_v9, %v1914_v27 }
0x212a   :  { %v1916_v24 = vpop.permute.xlu0 %1915 }
0x212b   :  { %v3399_v50 = vmul.f32 %v2637_v15, %v1916_v24 }
0x212d   :  { %v1921_v51 = vpack.c.bf16 %v3399_v50, %v3397_v42  ;;  %v2168_v17 = vpack.c.bf16 %v3399_v50, %v3399_v50 }
0x212f   :  { %1937 = vrot.lane.b32.xlu0 %v1921_v51, %s2841_s5 }
0x2130   :  { %v1062_v52 = vpop.permute.xlu1 %1061 }
0x2131   :  { %1065 = vst.msk [vmem:[#allocation2 + $0x30] sm:$0xff] %vm179_vm1, %v1062_v52 }
0x2138   :  { %v1072_v41 = vld [vmem:[#allocation2 + $0x30] sm:$0xff] }
0x2139   :  { %2348 = vmatmul.mubr.msk.bf16.gmra.mrb[52].mxu0 %vm179_vm1, %v1072_v41 }
0x21a1   :  { %v1938_v39 = vpop.permute.xlu0 %1937 }
0x21a2   :  { %2404 = vmatmul.mubr.msk.bf16.vlgmr.msra.gmra.mrb[52].mxu1 %vm179_vm1, %v1938_v39 }
0x220c   :  { %v1201_v56 = vpop.f32.mrb[52].mxu0 }
0x220d   :  { %v2349_v57 = vpop.f32.mrb[53].mxu0  ;;  %v1202_v60 = vadd.f32 %v2662_v43, %v1201_v56 }
0x220e   :  { %v1204_v0 = vpop.f32.mrb[54].mxu0 }
0x220f   :  { %v1205_v55 = vadd.f32 %v2662_v43, %v1204_v0  ;;  %v2350_v59 = vpop.f32.mrb[55].mxu0 }
0x2211   :  { %v1214_v61 = vpack.c.bf16 %v1205_v55, %v1202_v60 }
0x2213   :  { %v1983_v62 = vunpack.c.l.bf16 %v1214_v61  ;;  %v1984_v12 = vunpack.c.h.bf16 %v1214_v61 }
0x2275   :  { %v1976_v11 = vpop.f32.mrb[52].mxu1 }
0x2276   :  { %v1985_v3 = vadd.f32 %v1983_v62, %v1976_v11  ;;  %v2405_v63 = vpop.f32.mrb[53].mxu1 }
0x2277   :  { %v1979_v1 = vpop.f32.mrb[54].mxu1 }
0x2278   :  { %2646 = vtanh.f32 %v1985_v3  ;;  %v1986_v4 = vadd.f32 %v1984_v12, %v1979_v1  ;;  %v2406_v6 = vpop.f32.mrb[55].mxu1  ;;  %v2153_v8 = vmul.f32 -1.442695, %v1985_v3 }
0x227a   :  { %2648 = vtanh.f32 %v1986_v4  ;;  %v2154_v9 = vmul.f32 -1.442695, %v1986_v4 }
0x227b   :  { %2650 = vpow2.f32 %v2153_v8 }
0x227c   :  { %2652 = vpow2.f32 %v2154_v9 }
0x2282   :  { %v2647_v5 = vpop.eup %2646 }
0x2283   :  { %2005 = vrot.lane.b32.xlu1 %v2647_v5, %s2829_s9 }
0x2284   :  { %v2649_v7 = vpop.eup %2648 }
0x2285   :  { %2007 = vrot.lane.b32.xlu0 %v2649_v7, %s2829_s9  ;;  %v2651_v10 = vpop.eup %2650 }
0x2286   :  { %v2653_v13 = vpop.eup %2652  ;;  %v1993_v15 = vadd.f32 1.0, %v2651_v10 }
0x2287   :  { %v1994_v14 = vadd.f32 1.0, %v2653_v13 }
0x2288   :  { %2654 = vrcp.f32 %v1993_v15 }
0x2289   :  { %2656 = vrcp.f32 %v1994_v14 }
0x2292   :  { %v2655_v44 = vpop.eup %2654 }
0x2293   :  { %v2657_v58 = vpop.eup %2656  ;;  %v2001_v20 = vmul.f32 %v2655_v44, %v3387_v45  ;;  %v2158_v45 = vpack.c.bf16 %v3263_v47, %v3263_v47  ;;  %v2162_v47 = vpack.c.bf16 %v3307_v49, %v3307_v49  ;;  %v2166_v49 = vpack.c.bf16 %v3360_v34, %v3360_v34 }
0x2294   :  { %v2002_v28 = vmul.f32 %v2657_v58, %v3391_v32  ;;  %v2159_v32 = vpack.c.bf16 %v3283_v23, %v3283_v23  ;;  %v2163_v23 = vpack.c.bf16 %v3327_v53, %v3327_v53  ;;  %v2167_v53 = vpack.c.bf16 %v3397_v42, %v3397_v42 }
0x22f5   :  { %v2006_v2 = vpop.permute.xlu1 %2005 }
0x22f6   :  { %v2011_v16 = vmul.f32 %v2655_v44, %v2006_v2 }
0x22f7   :  { %v2008_v18 = vpop.permute.xlu0 %2007 }
0x22f8   :  { %2015 = vrot.lane.b32.xlu1 %v2011_v16, %s2841_s5  ;;  %v2012_v19 = vmul.f32 %v2657_v58, %v2008_v18 }
0x22fa   :  { %2017 = vrot.lane.b32.xlu0 %v2012_v19, %s2841_s5 }
0x236a   :  { %v2016_v22 = vpop.permute.xlu1 %2015 }
0x236b   :  { %v2021_v26 = vadd.f32 %v2016_v22, %v2001_v20 }
0x236c   :  { %v2018_v30 = vpop.permute.xlu0 %2017 }
0x236d   :  { %2658 = vtanh.f32 %v2021_v26  ;;  %v2022_v29 = vadd.f32 %v2018_v30, %v2002_v28 }
0x236f   :  { %2660 = vtanh.f32 %v2022_v29 }
0x2377   :  { %v2659_v48 = vpop.eup %2658 }
0x2378   :  { %2027 = vrot.lane.b32.xlu1 %v2659_v48, %s2829_s9 }
0x2379   :  { %v2661_v31 = vpop.eup %2660 }
0x237a   :  { %2029 = vrot.lane.b32.xlu0 %v2661_v31, %s2829_s9 }
0x237c   :  { %1357 = vrot.lane.b32.xlu1 %v2157_v35, %s2841_s5 }
0x237e   :  { %1359 = vrot.lane.b32.xlu0 %v2158_v45, %s2841_s5 }
0x2380   :  { %1471 = vrot.lane.b32.xlu1 %v2159_v32, %s2841_s5 }
0x2382   :  { %1473 = vrot.lane.b32.xlu0 %v2160_v36, %s2841_s5 }
0x2384   :  { %1585 = vrot.lane.b32.xlu1 %v2161_v46, %s2841_s5 }
0x2386   :  { %1587 = vrot.lane.b32.xlu0 %v2162_v47, %s2841_s5 }
0x2388   :  { %1699 = vrot.lane.b32.xlu1 %v2163_v23, %s2841_s5 }
0x238a   :  { %1701 = vrot.lane.b32.xlu0 %v2164_v25, %s2841_s5 }
0x238c   :  { %1813 = vrot.lane.b32.xlu1 %v2165_v54, %s2841_s5 }
0x238e   :  { %1815 = vrot.lane.b32.xlu0 %v2166_v49, %s2841_s5 }
0x2390   :  { %1927 = vrot.lane.b32.xlu1 %v2167_v53, %s2841_s5 }
0x2392   :  { %1929 = vrot.lane.b32.xlu0 %v2168_v17, %s2841_s5 }
0x23ea   :  { %v2028_v33 = vpop.permute.xlu1 %2027 }
0x23eb   :  { %v2033_v21 = vmul.f32 %v2655_v44, %v2028_v33 }
0x23ec   :  { %v2030_v38 = vpop.permute.xlu0 %2029 }
0x23ed   :  { %v2169_v37 = vpack.c.bf16 %v2033_v21, %v2033_v21  ;;  %v2034_v40 = vmul.f32 %v2657_v58, %v2030_v38 }
0x23ee   :  { %v1358_v27 = vpop.permute.xlu1 %1357 }
0x23ef   :  { %1364 = vst.msk [vmem:[#allocation15] sm:$0xf] %vm1363_vm2, %v1358_v27  ;;  %2041 = vrot.lane.b32.xlu1 %v2169_v37, %s2841_s5  ;;  %v2170_v34 = vpack.c.bf16 %v2034_v40, %v2034_v40 }
0x23f0   :  { %v1360_v24 = vpop.permute.xlu0 %1359 }
0x23f1   :  { %1365 = vst.msk [vmem:[#allocation15 + $0x4] sm:$0xf] %vm1363_vm2, %v1360_v24  ;;  %2043 = vrot.lane.b32.xlu0 %v2170_v34, %s2841_s5 }
0x23f2   :  { %v1472_v42 = vpop.permute.xlu1 %1471 }
0x23f3   :  { %1478 = vst.msk [vmem:[#allocation15 + $0x8] sm:$0xf] %vm1363_vm2, %v1472_v42 }
0x23f4   :  { %v1474_v50 = vpop.permute.xlu0 %1473 }
0x23f5   :  { %1479 = vst.msk [vmem:[#allocation15 + $0xc] sm:$0xf] %vm1363_vm2, %v1474_v50 }
0x23f6   :  { %v1586_v51 = vpop.permute.xlu1 %1585 }
0x23f7   :  { %1592 = vst.msk [vmem:[#allocation15 + $0x10] sm:$0xf] %vm1363_vm2, %v1586_v51 }
0x23f8   :  { %v1588_v52 = vpop.permute.xlu0 %1587 }
0x23f9   :  { %1593 = vst.msk [vmem:[#allocation15 + $0x14] sm:$0xf] %vm1363_vm2, %v1588_v52 }
0x23fa   :  { %v1700_v41 = vpop.permute.xlu1 %1699 }
0x23fb   :  { %1706 = vst.msk [vmem:[#allocation15 + $0x18] sm:$0xf] %vm1363_vm2, %v1700_v41 }
0x23fc   :  { %v1702_v39 = vpop.permute.xlu0 %1701 }
0x23fd   :  { %1707 = vst.msk [vmem:[#allocation15 + $0x1c] sm:$0xf] %vm1363_vm2, %v1702_v39 }
0x23fe   :  { %v1814_v56 = vpop.permute.xlu1 %1813 }
0x23ff   :  { %1820 = vst.msk [vmem:[#allocation15 + $0x20] sm:$0xf] %vm1363_vm2, %v1814_v56 }
0x2400   :  { %v1816_v57 = vpop.permute.xlu0 %1815 }
0x2401   :  { %1821 = vst.msk [vmem:[#allocation15 + $0x24] sm:$0xf] %vm1363_vm2, %v1816_v57 }
0x2402   :  { %v1928_v0 = vpop.permute.xlu1 %1927 }
0x2403   :  { %1934 = vst.msk [vmem:[#allocation15 + $0x28] sm:$0xf] %vm1363_vm2, %v1928_v0 }
0x2404   :  { %v1930_v43 = vpop.permute.xlu0 %1929 }
0x2405   :  { %1935 = vst.msk [vmem:[#allocation15 + $0x2c] sm:$0xf] %vm1363_vm2, %v1930_v43 }
0x2461   :  { %v2042_v60 = vpop.permute.xlu1 %2041 }
0x2462   :  { %2048 = vst.msk [vmem:[#allocation15 + $0x30] sm:$0xf] %vm1363_vm2, %v2042_v60 }
0x2463   :  { %v2044_v55 = vpop.permute.xlu0 %2043 }
0x2464   :  { %2049 = vst.msk [vmem:[#allocation15 + $0x34] sm:$0xf] %vm1363_vm2, %v2044_v55 }
0x2465   :  { %2806 = shalt.err (!%p2803_p10)
}
0x2466   :  { %s2807_s29 = scalar_lea.hbm %s3488_s6, 896 }
0x2467   :  { %p2808_p11 = scmp.ne.s32.totalorder %s3488_s6, %s2807_s29  ;;  %p2811_p12 = scmp.lt.u32.totalorder %s2807_s29, %s3488_s6 }
0x2469   :  { %p2813_p13 = pnand %p2811_p12, %p2808_p11 }
0x246b   :  { %2816 = shalt.err (!%p2813_p13)
}
0x246c   :  { %2061 = dma.vmem_to_hbm [thread:$0]  %s2056_s23, 896, %s3488_s6, [#allocation6], %s2829_s9, %s2829_s9, %s2830_s10  }
0x246d   :  { %2825 = dma.done.wait [#allocation6], 896  }
0x246e   :  { %2826 = vsyncadd [#allocation6], 4294966400 }
0x246f   :  { %2065 = vsyncpa [#allocation5], 1 }
0x2470   :  { %2066 = vsyncpa [#allocation8], 1 }
0x2471   :  { %2067 = vsyncpa [#allocation11], 1 }
0x2472   :  { %2068 = vsyncpa [#allocation14], 1 }
0x2473   :  { %2069 = vsyncpa [#allocation6], 1 }

</bundles_post_ra>
